<compile_context>
chip_gen: v7x
topology: tpu7x:2x2x1
jax: 0.10.0
libtpu: 0.0.40
codegen_flags: <defaults>
</compile_context>

<pallas_src>
import jax
import jax.numpy as jnp
from jax import lax
from jax.experimental import pallas as pl
from jax.experimental.pallas import tpu as pltpu


def attention_kernel(kw_ref, q_ref, bank_ref, bias_ref, out_ref):
    # kw_ref:   (1, O, D)    bf16   key projection weights for this head
    # q_ref:    (1, TN, O)   f32    precomputed tanh(query proj), this head/tile
    # bank_ref: (TN, S, D)   bf16/f32 (caller dtype)
    # bias_ref: (TN, S)      f32    additive mask bias (0 or -1e8)
    # out_ref:  (1, TN, D)   bf16
    Kw = kw_ref[0]                       # (O, D)
    q = q_ref[0]                         # (TN, O) f32
    bank = bank_ref[...]                 # (TN, S, D)
    bias = bias_ref[...]                 # (TN, S)  f32

    TN, S, D = bank.shape
    O = Kw.shape[0]

    # Key projection on the MXU: flatten (node, sentence) into a tall matmul.
    # (TN*S, D) x (O, D)^T -> (TN*S, O), bf16 operands, f32 accumulate, f32 tanh.
    # D=768 / O=128 are lane-dense so both reshapes are layout no-ops.
    bank_mxu = bank.astype(jnp.bfloat16).reshape(TN * S, D)
    k = jnp.tanh(
        lax.dot_general(bank_mxu, Kw, (((1,), (1,)), ((), ())),
                        preferred_element_type=jnp.float32))
    k = k.reshape(TN, S, O)                                   # (TN, S, O) f32

    # Attention scores on the VPU/XLU (dense VALU work instead of TN serialized
    # 1-row MXU matmuls): score[n,s] = sum_o k[n,s,o] * q[n,o], plus mask bias.
    score = jnp.sum(k * q[:, None, :], axis=-1) + bias        # (TN, S) f32

    # Numerically-stable softmax over S; reciprocal on the EUP (free slot).
    score = score - jnp.max(score, axis=-1, keepdims=True)
    e = jnp.exp(score)
    p = e * pl.reciprocal(jnp.sum(e, axis=-1, keepdims=True), approx=True)

    # Weighted sum of the bank over sentences, again on the VPU:
    # emb[n,d] = sum_s p[n,s] * bank[n,s,d]   (f32 accumulate).
    emb = jnp.sum(p[:, :, None] * bank, axis=1)               # (TN, D) f32

    out_ref[0] = emb.astype(out_ref.dtype)                    # bf16 writeback


def _round_up(a, b):
    return (a + b - 1) // b * b


def _choose_tn(n, max_block_n):
    """Largest multiple-of-8 tile that divides n (so bank needs no padding),
    preferring a tile that leaves >= 2 node blocks so both v7x TensorCores
    get work under the 'parallel' n axis."""
    if n % 8 != 0 or max_block_n < 8:
        return None
    cap = min(n, max_block_n)
    divisors = [t for t in range(8, cap + 1, 8) if n % t == 0]
    if not divisors:
        return None
    multi = [t for t in divisors if n // t >= 2]
    return max(multi) if multi else max(divisors)


def _vmem_limit_bytes(tn, S, D, O, bank_itemsize):
    """Scoped-VMEM budget: double-buffered streamed tiles + in-kernel temps.
    v5e's 16 MiB default is too small for tn=256; cap below v7x's 64 MiB
    physical VMEM (v5e/v6e have 128 MiB, so the cap is always safe)."""
    bank_tile = tn * S * D * bank_itemsize
    stream = 2 * (bank_tile + tn * S * 4 + tn * O * 4 + O * D * 2 + tn * D * 2)
    temps = (tn * S * D * 2      # in-VMEM bf16 copy of the bank tile for the MXU
             + tn * S * O * 4    # key-projection / tanh output
             + tn * S * D * 4    # p * bank product before the S reduce
             + 4 * tn * D * 4)   # emb and small leftovers
    return int(min(max(stream + temps + (4 << 20), 32 << 20), 56 << 20))


def attention_module(query_w, key_w, x, bank, mask, *,
                     max_block_n=256, out_dtype=jnp.float32):
    """query_w: (H, O, L*D), key_w: (H, O, D), x: (N, L*D), bank: (N, S, D),
    mask: (N, S).  Returns (N, H, D) in `out_dtype` (f32 default, matching the
    torch module).  Pass bank as bf16 to halve the dominant HBM stream.
    max_block_n: 256 is safe on all generations; v5e/v6e (128 MiB VMEM) can go
    higher once the VMEM cap in _vmem_limit_bytes is raised."""
    H, O, LD = query_w.shape
    _, _, D = key_w.shape
    N, S, _ = bank.shape

    # Hoisted query projection: one well-shaped fused XLA GEMM over all heads
    # instead of a per-head, N-row in-kernel matmul.  Kept f32 (tiny stream).
    q = jnp.tanh(jnp.einsum('ni,hoi->hno', x, query_w,
                            preferred_element_type=jnp.float32))      # (H, N, O)

    # Additive mask bias (replaces the in-kernel compare+select).
    bias = jnp.where(mask == 0, jnp.float32(-1e8), jnp.float32(0.0))  # (N, S)

    n_total = N
    tn = _choose_tn(N, max_block_n)
    if tn is None:
        # N not a multiple of 8: fall back to padding (full extra pass over
        # bank in XLA).  TODO(synk): ragged-tail handling in-kernel instead.
        n_total = _round_up(N, 8)
        pad = n_total - N
        q = jnp.pad(q, ((0, 0), (0, pad), (0, 0)))
        bias = jnp.pad(bias, ((0, pad), (0, 0)))
        bank = jnp.pad(bank, ((0, pad), (0, 0), (0, 0)))
        tn = _choose_tn(n_total, max_block_n)

    kw_bf = key_w.astype(jnp.bfloat16)     # tiny (H, O, D) weight
    num_n_blocks = n_total // tn

    out = pl.pallas_call(
        attention_kernel,
        out_shape=jax.ShapeDtypeStruct((H, n_total, D), jnp.bfloat16),
        grid_spec=pltpu.PrefetchScalarGridSpec(
            num_scalar_prefetch=0,
            # n outer ("parallel", sharded across v7x TensorCores), h inner
            # ("arbitrary", sequential): the big (tn, S, D) bank tile keeps the
            # same block index across the head loop -> no re-DMA per head.
            grid=(num_n_blocks, H),
            in_specs=[
                pl.BlockSpec((1, O, D), lambda n, h: (h, 0, 0)),      # Key weights
                pl.BlockSpec((1, tn, O), lambda n, h: (h, n, 0)),     # precomputed q
                pl.BlockSpec((tn, S, D), lambda n, h: (n, 0, 0)),     # bank tile
                pl.BlockSpec((tn, S), lambda n, h: (n, 0)),           # mask bias
            ],
            out_specs=pl.BlockSpec((1, tn, D), lambda n, h: (h, n, 0)),
        ),
        compiler_params=pltpu.CompilerParams(
            dimension_semantics=("parallel", "arbitrary"),
            vmem_limit_bytes=_vmem_limit_bytes(tn, S, D, O,
                                               jnp.dtype(bank.dtype).itemsize)),
    )(kw_bf, q, bank, bias)

    out = out[:, :N, :]                     # drop node padding (if any)
    out = jnp.transpose(out, (1, 0, 2))     # (N, H, D)
    return out.astype(out_dtype)


def _reference(query_w, key_w, x, bank, mask):
    # Pure-JAX (f32) mirror of the PyTorch forward for verification.
    q = jnp.tanh(jnp.einsum('hoi,ni->hon', query_w, x))          # (H, O, N)
    k = jnp.tanh(jnp.einsum('hod,nsd->hnos', key_w, bank))       # (H, N, O, S)
    score = jnp.einsum('hnos,hon->hns', k, q)                    # (H, N, S)
    score = jnp.where(mask[None] == 0, -1e8, score)
    p = jax.nn.softmax(score, axis=-1)                           # (H, N, S)
    emb = jnp.einsum('hns,nsd->hnd', p, bank)                    # (H, N, D)
    return jnp.transpose(emb, (1, 0, 2))                         # (N, H, D)


if __name__ == "__main__":
    # Module hyperparameters (match __init__: head_num=1, out_dim=128,
    # num_layers=3, 768-dim sentence embeddings).
    H, O, L, D = 1, 128, 3, 768
    LD = L * D
    # Small data shapes
    N, S = 8, 16

    key = jax.random.PRNGKey(0)
    k1, k2, k3, k4, k5 = jax.random.split(key, 5)

    # xavier_uniform: fan_in = size(1)*rf, fan_out = size(0)*rf
    bq = jnp.sqrt(6.0 / (O * LD + H * LD))
    bk = jnp.sqrt(6.0 / (O * D + H * D))
    query_w = jax.random.uniform(k1, (H, O, LD), jnp.float32, -bq, bq)
    key_w = jax.random.uniform(k2, (H, O, D), jnp.float32, -bk, bk)

    x = jax.random.normal(k3, (N, LD), jnp.float32)
    bank = jax.random.normal(k4, (N, S, D), jnp.float32)
    mask = (jax.random.uniform(k5, (N, S)) > 0.3).astype(jnp.float32)
    mask = mask.at[:, 0].set(1.0)  # every node has at least one valid sentence

    out = attention_module(query_w, key_w, x, bank, mask)
    out = jax.block_until_ready(out)

    ref = _reference(query_w, key_w, x, bank, mask)
    assert out.shape == (N, H, D)
    # The MXU key projection uses bf16 bank/Key, softmax uses an approximate
    # EUP reciprocal, and the kernel writes bf16 -> compare against the f32
    # reference with a correspondingly looser tolerance.
    assert jnp.allclose(out, ref, atol=1e-2, rtol=1e-2), "mismatch vs reference"

    print("KERNEL_OK")
</pallas_src>

<mosaic_0001>
module attributes {stable_mosaic.version = 11 : i64} {
  func.func @attention_kernel(%arg0: i32, %arg1: i32, %arg2: memref<1x128x768xbf16, #tpu.memory_space<vmem>>, %arg3: memref<1x8x128xf32, #tpu.memory_space<vmem>>, %arg4: memref<8x16x768xf32, #tpu.memory_space<vmem>>, %arg5: memref<8x16xf32, #tpu.memory_space<vmem>>, %arg6: memref<1x8x768xbf16, #tpu.memory_space<vmem>>) attributes {dimension_semantics = [#tpu.dimension_semantics<parallel>, #tpu.dimension_semantics<arbitrary>], iteration_bounds = array<i64: 1, 1>, scalar_prefetch = 0 : i64, scratch_operands = 0 : i64, tpu.core_type = #tpu.core_type<tc>, window_params = [{transform_indices = @transform_0, window_bounds = array<i64: 1, 128, 768>}, {transform_indices = @transform_1, window_bounds = array<i64: 1, 8, 128>}, {transform_indices = @transform_2, window_bounds = array<i64: 8, 16, 768>}, {transform_indices = @transform_3, window_bounds = array<i64: 8, 16>}, {transform_indices = @transform_4, window_bounds = array<i64: 1, 8, 768>}]} {
    %c0 = arith.constant 0 : index
    %c0_0 = arith.constant 0 : index
    %c0_1 = arith.constant 0 : index
    %0 = vector.load %arg2[%c0, %c0_0, %c0_1] : memref<1x128x768xbf16, #tpu.memory_space<vmem>>, vector<1x128x768xbf16>
    %1 = vector.shape_cast %0 : vector<1x128x768xbf16> to vector<128x768xbf16>
    %c0_2 = arith.constant 0 : index
    %c0_3 = arith.constant 0 : index
    %c0_4 = arith.constant 0 : index
    %2 = vector.load %arg3[%c0_2, %c0_3, %c0_4] : memref<1x8x128xf32, #tpu.memory_space<vmem>>, vector<1x8x128xf32>
    %3 = vector.shape_cast %2 : vector<1x8x128xf32> to vector<8x128xf32>
    %c0_5 = arith.constant 0 : index
    %c0_6 = arith.constant 0 : index
    %c0_7 = arith.constant 0 : index
    %4 = vector.load %arg4[%c0_5, %c0_6, %c0_7] : memref<8x16x768xf32, #tpu.memory_space<vmem>>, vector<8x16x768xf32>
    %c0_8 = arith.constant 0 : index
    %c0_9 = arith.constant 0 : index
    %5 = vector.load %arg5[%c0_8, %c0_9] : memref<8x16xf32, #tpu.memory_space<vmem>>, vector<8x16xf32>
    %6 = arith.truncf %4 : vector<8x16x768xf32> to vector<8x16x768xbf16>
    %7 = vector.shape_cast %6 : vector<8x16x768xbf16> to vector<128x768xbf16>
    %cst = arith.constant dense<0.000000e+00> : vector<128x128xf32>
    %8 = tpu.matmul %7, %1, %cst {dimension_numbers = #tpu.dot_dimension_numbers<[1], [1], [0], [0], [0, 0, 1, 0], [], []>} : vector<128x768xbf16>, vector<128x768xbf16>, vector<128x128xf32> -> vector<128x128xf32>
    %9 = math.tanh %8 : vector<128x128xf32>
    %10 = vector.shape_cast %9 : vector<128x128xf32> to vector<8x16x128xf32>
    %11 = vector.shape_cast %3 : vector<8x128xf32> to vector<8x1x128xf32>
    %12 = vector.broadcast %11 : vector<8x1x128xf32> to vector<8x16x128xf32>
    %13 = arith.mulf %10, %12 : vector<8x16x128xf32>
    %cst_10 = arith.constant dense<0.000000e+00> : vector<8x16xf32>
    %14 = vector.multi_reduction <add>, %13, %cst_10 [2] : vector<8x16x128xf32> to vector<8x16xf32>
    %15 = arith.addf %14, %5 : vector<8x16xf32>
    %cst_11 = arith.constant dense<0xFF800000> : vector<8xf32>
    %16 = vector.multi_reduction <maximumf>, %15, %cst_11 [1] : vector<8x16xf32> to vector<8xf32>
    %17 = vector.shape_cast %16 : vector<8xf32> to vector<8x1xf32>
    %18 = vector.broadcast %17 : vector<8x1xf32> to vector<8x16xf32>
    %19 = arith.subf %15, %18 : vector<8x16xf32>
    %20 = math.exp %19 : vector<8x16xf32>
    %cst_12 = arith.constant dense<0.000000e+00> : vector<8xf32>
    %21 = vector.multi_reduction <add>, %20, %cst_12 [1] : vector<8x16xf32> to vector<8xf32>
    %22 = vector.shape_cast %21 : vector<8xf32> to vector<8x1xf32>
    %23 = tpu.reciprocal %22 {approx = true} : vector<8x1xf32> -> vector<8x1xf32>
    %24 = vector.broadcast %23 : vector<8x1xf32> to vector<8x16xf32>
    %25 = arith.mulf %20, %24 : vector<8x16xf32>
    %26 = vector.shape_cast %25 : vector<8x16xf32> to vector<8x16x1xf32>
    %27 = vector.broadcast %26 : vector<8x16x1xf32> to vector<8x16x768xf32>
    %28 = arith.mulf %27, %4 : vector<8x16x768xf32>
    %cst_13 = arith.constant dense<0.000000e+00> : vector<8x768xf32>
    %29 = vector.multi_reduction <add>, %28, %cst_13 [1] : vector<8x16x768xf32> to vector<8x768xf32>
    %30 = arith.truncf %29 : vector<8x768xf32> to vector<8x768xbf16>
    %c0_14 = arith.constant 0 : index
    %c0_15 = arith.constant 0 : index
    %c0_16 = arith.constant 0 : index
    %31 = vector.load %arg6[%c0_14, %c0_15, %c0_16] : memref<1x8x768xbf16, #tpu.memory_space<vmem>>, vector<1x8x768xbf16>
    %32 = vector.shape_cast %31 : vector<1x8x768xbf16> to vector<8x768xbf16>
    %33 = vector.shape_cast %30 : vector<8x768xbf16> to vector<1x8x768xbf16>
    tpu.vector_store %arg6[%c0_14, %c0_15, %c0_16], %33 {strides = array<i32>} : memref<1x8x768xbf16, #tpu.memory_space<vmem>>, vector<1x8x768xbf16>,
    return
  }
  func.func @transform_0(%arg0: i32, %arg1: i32) -> (i32, i32, i32) {
    %c0_i32 = arith.constant 0 : i32
    %c0_i32_0 = arith.constant 0 : i32
    %c0_i32_1 = arith.constant 0 : i32
    return %arg1, %c0_i32, %c0_i32_0 : i32, i32, i32
  }
  func.func @transform_1(%arg0: i32, %arg1: i32) -> (i32, i32, i32) {
    %c0_i32 = arith.constant 0 : i32
    %c0_i32_0 = arith.constant 0 : i32
    return %arg1, %arg0, %c0_i32 : i32, i32, i32
  }
  func.func @transform_2(%arg0: i32, %arg1: i32) -> (i32, i32, i32) {
    %c0_i32 = arith.constant 0 : i32
    %c0_i32_0 = arith.constant 0 : i32
    %c0_i32_1 = arith.constant 0 : i32
    return %arg0, %c0_i32, %c0_i32_0 : i32, i32, i32
  }
  func.func @transform_3(%arg0: i32, %arg1: i32) -> (i32, i32) {
    %c0_i32 = arith.constant 0 : i32
    %c0_i32_0 = arith.constant 0 : i32
    return %arg0, %c0_i32 : i32, i32
  }
  func.func @transform_4(%arg0: i32, %arg1: i32) -> (i32, i32, i32) {
    %c0_i32 = arith.constant 0 : i32
    %c0_i32_0 = arith.constant 0 : i32
    return %arg1, %arg0, %c0_i32 : i32, i32, i32
  }
}

</mosaic_0001>

<bundles_post_ra>
// kernel: tpu_custom_call.1
= control target key start
LH: loop header
LB: loop body
LE: loop exit
PB: predicated region body
PF: predicated region fallthrough
CT: control target
= control target key end

     0   :  { %9 = vsyncpa [#allocation3], 0  ;;  %s3472_s0 = inlined_call_operand.hbm [shape: bf16[1,128,768], index: 0, kind: input, shape index: {}]   ;;  %s3473_s1 = inlined_call_operand.hbm [shape: f32[1,8,128], index: 1, kind: input, shape index: {}]   ;;  %s3474_s2 = inlined_call_operand.hbm [shape: f32[8,16,768], index: 2, kind: input, shape index: {}]   ;;  %s3475_s3 = inlined_call_operand.vmem [shape: f32[8,16], index: 3, kind: input, shape index: {}]   ;;  %s3476_s4 = inlined_call_operand.hbm [shape: bf16[1,8,768], index: 4, kind: output, shape index: {}]  }
   0x1   :  { %10 = vsyncpa [#allocation6], 0 }
   0x2   :  { %11 = vsyncpa [#allocation4], 0  ;;  %s2799_s15 = smov [#allocation5]   ;;  %s2800_s17 = smov [#allocation2]  }
   0x3   :  { %s30_s16 = sshll.u32 %s2799_s15, 4  ;;  %s17_s18 = sshll.u32 %s2800_s17, 4  ;;  %s31_s16 = int_to_ptr.vmem [resolvable:$true] %s30_s16  ;;  %s2834_s18 = int_to_ptr.vmem [resolvable:$true] %s17_s18 }
   0x4   :  { %s2705_s21 = scalar_lea.hbm %s3473_s1, 128 }
   0x5   :  { %p2706_p0 = scmp.ne.s32.totalorder %s3473_s1, %s2705_s21  ;;  %p2709_p1 = scmp.lt.u32.totalorder %s2705_s21, %s3473_s1 }
   0x7   :  { %p2711_p2 = pnand %p2709_p1, %p2706_p0 }
   0x9   :  { %2714 = shalt.err (!%p2711_p2)
}
   0xa   :  { %s2715_s26 = scalar_lea.vmem %s31_s16, 128  ;;  %p2720_p4 = scmp.lt.s32.totalorder %s31_s16, %s31_s16 }
   0xb   :  { %p2716_p3 = scmp.ne.s32.totalorder %s31_s16, %s2715_s26  ;;  %p2721_p5 = scmp.lt.s32.totalorder %s2715_s26, %s2715_s26 }
   0xd   :  { %p2722_p6 = por %p2721_p5, %p2720_p4 }
   0xf   :  { %p2723_p7 = pnand %p2722_p6, %p2716_p3 }
  0x11   :  { %2726 = shalt.err (!%p2723_p7)
}
  0x12   :  { %33 = dma.hbm_to_vmem [thread:$0]  %s3473_s1, 128, %s31_s16, [#allocation6]  }
  0x13   :  { %s2727_s5 = scalar_lea.hbm %s3472_s0, 6144 }
  0x14   :  { %p2728_p8 = scmp.ne.s32.totalorder %s3472_s0, %s2727_s5  ;;  %p2731_p9 = scmp.lt.u32.totalorder %s2727_s5, %s3472_s0 }
  0x16   :  { %p2733_p10 = pnand %p2731_p9, %p2728_p8 }
  0x18   :  { %2736 = shalt.err (!%p2733_p10)
}
  0x19   :  { %s2737_s10 = scalar_lea.vmem %s2834_s18, 6144  ;;  %p2742_p12 = scmp.lt.s32.totalorder %s2834_s18, %s2834_s18 }
  0x1a   :  { %p2738_p11 = scmp.ne.s32.totalorder %s2834_s18, %s2737_s10  ;;  %p2743_p13 = scmp.lt.s32.totalorder %s2737_s10, %s2737_s10 }
  0x1c   :  { %p2744_p0 = por %p2743_p13, %p2742_p12 }
  0x1e   :  { %p2745_p1 = pnand %p2744_p0, %p2738_p11 }
  0x20   :  { %2748 = shalt.err (!%p2745_p1)
}
  0x21   :  { %s2801_s1 = smov 384   ;;  %s2802_s11 = smov 24  }
  0x22   :  { %23 = dma.hbm_to_vmem [thread:$0]  %s3472_s0, 6144, %s2834_s18, [#allocation3], %s2801_s1, %s2801_s1, %s2802_s11  }
  0x23   :  { %s2803_s14 = smov [#allocation7]   ;;  %s2749_s19 = scalar_lea.hbm %s3474_s2, 12288 }
  0x24   :  { %s39_s15 = sshll.u32 %s2803_s14, 4  ;;  %p2750_p2 = scmp.ne.s32.totalorder %s3474_s2, %s2749_s19  ;;  %s40_s15 = int_to_ptr.vmem [resolvable:$true] %s39_s15 }
  0x25   :  { %p2753_p3 = scmp.lt.u32.totalorder %s2749_s19, %s3474_s2 }
  0x27   :  { %p2755_p4 = pnand %p2753_p3, %p2750_p2 }
  0x29   :  { %2758 = shalt.err (!%p2755_p4)
}
  0x2a   :  { %s2759_s24 = scalar_lea.vmem %s40_s15, 12288  ;;  %p2764_p6 = scmp.lt.s32.totalorder %s40_s15, %s40_s15 }
  0x2b   :  { %p2760_p5 = scmp.ne.s32.totalorder %s40_s15, %s2759_s24  ;;  %p2765_p7 = scmp.lt.s32.totalorder %s2759_s24, %s2759_s24 }
  0x2d   :  { %p2766_p8 = por %p2765_p7, %p2764_p6 }
  0x2f   :  { %p2767_p9 = pnand %p2766_p8, %p2760_p5 }
  0x31   :  { %2770 = shalt.err (!%p2767_p9)
}
  0x32   :  { %s2804_s0 = smov 768   ;;  %s2805_s18 = smov 48  }
  0x33   :  { %45 = dma.hbm_to_vmem [thread:$0]  %s3474_s2, 12288, %s40_s15, [#allocation6], %s2804_s0, %s2804_s0, %s2805_s18  }
  0x34   :  { %2793 = dma.done.wait [#allocation3], 6144  }
  0x35   :  { %2794 = vsyncadd [#allocation3], 4294961152 }
  0x36   :  { %2795 = dma.done.wait [#allocation6], 12416  }
  0x37   :  { %2796 = vsyncadd [#allocation6], 4294954880  ;;  %v2470_v0 = vld [vmem:[#allocation2 + $0x4] ss:$24 sps:$4 sm:$0xff]   ;;  %v2474_v2 = vld [vmem:[#allocation2] ss:$24 sps:$4 sm:$0xff]  }
  0x38   :  { %v2472_v1 = vld [vmem:[#allocation2 + $0xc] ss:$24 sps:$4 sm:$0xff]   ;;  %492 = vmatprep.subr.bf16.mxu1 %v2470_v0  ;;  %v2475_v3 = vld [vmem:[#allocation2 + $0x8] ss:$24 sps:$4 sm:$0xff]   ;;  %v2478_v5 = vld [vmem:[#allocation2 + $0x3c] ss:$24 sps:$4 sm:$0xff]  }
  0x39   :  { %589 = vmatprep.subr.bf16.mxu0 %v2472_v1  ;;  %v2476_v4 = vld [vmem:[#allocation2 + $0x34] ss:$24 sps:$4 sm:$0xff]   ;;  %493 = vmatpush1.bf16.xpose.msra.mxu1 %v2474_v2  ;;  %v2480_v6 = vld [vmem:[#allocation2 + $0x30] ss:$24 sps:$4 sm:$0xff]   ;;  %v2482_v8 = vld [vmem:[#allocation2 + $0x64] ss:$24 sps:$4 sm:$0xff]  }
  0x3a   :  { %590 = vmatpush1.bf16.xpose.msra.mxu0 %v2475_v3  ;;  %494 = vmatprep.subr.bf16.mxu1 %v2476_v4  ;;  %v2481_v7 = vld [vmem:[#allocation2 + $0x38] ss:$24 sps:$4 sm:$0xff]   ;;  %v2484_v9 = vld [vmem:[#allocation2 + $0x6c] ss:$24 sps:$4 sm:$0xff]   ;;  %v2487_v11 = vld [vmem:[#allocation2 + $0x68] ss:$24 sps:$4 sm:$0xff]  }
  0x3b   :  { %591 = vmatprep.subr.bf16.mxu0 %v2478_v5  ;;  %v2486_v10 = vld [vmem:[#allocation2 + $0x60] ss:$24 sps:$4 sm:$0xff]   ;;  %v2488_v12 = vld [vmem:[#allocation2 + $0x94] ss:$24 sps:$4 sm:$0xff]   ;;  %v2492_v19 = vld [vmem:[#allocation2 + $0x90] ss:$24 sps:$4 sm:$0xff]  }
  0x3c   :  { %v2490_v13 = vld [vmem:[#allocation2 + $0x9c] ss:$24 sps:$4 sm:$0xff]   ;;  %v114_v15 = vld [vmem:[#allocation7 + $0x38] sm:$0xff]  ;;  %v2493_v21 = vld [vmem:[#allocation2 + $0x98] ss:$24 sps:$4 sm:$0xff]   ;;  %vm1133_vm0 = vcmask 130112  }
  0x3d   :  { %v108_v14 = vld [vmem:[#allocation7 + $0x8] sm:$0xff]  ;;  %v110_v17 = vld [vmem:[#allocation7 + $0x18] sm:$0xff]  ;;  %v107_v39 = vld [vmem:[#allocation7] sm:$0xff]  ;;  %vm1198_vm1 = vcmask 1041409   ;;  %vm1200_vm2 = vcmask 1042434   ;;  %vm1202_vm3 = vcmask 1043459  }
  0x3e   :  { %v205_v16 = vpack.c.bf16 %v114_v15, %v108_v14  ;;  %v116_v18 = vld [vmem:[#allocation7 + $0x48] sm:$0xff]  ;;  %v2494_v22 = vld [vmem:[#allocation2 + $0xc4] ss:$24 sps:$4 sm:$0xff]   ;;  %v2498_v24 = vld [vmem:[#allocation2 + $0xc0] ss:$24 sps:$4 sm:$0xff]   ;;  %vm1204_vm4 = vcmask 1044484  }
  0x3f   :  { %v207_v20 = vpack.c.bf16 %v116_v18, %v110_v17  ;;  %v2496_v23 = vld [vmem:[#allocation2 + $0xcc] ss:$24 sps:$4 sm:$0xff]   ;;  %v2499_v25 = vld [vmem:[#allocation2 + $0xc8] ss:$24 sps:$4 sm:$0xff]   ;;  %v2502_v27 = vld [vmem:[#allocation2 + $0xfc] ss:$24 sps:$4 sm:$0xff]  }
  0x40   :  { %524 = vmatprep.mubr.bf16.mxu1 %v205_v16  ;;  %v2500_v26 = vld [vmem:[#allocation2 + $0xf4] ss:$24 sps:$4 sm:$0xff]   ;;  %v2504_v28 = vld [vmem:[#allocation2 + $0xf0] ss:$24 sps:$4 sm:$0xff]   ;;  %v2506_v30 = vld [vmem:[#allocation2 + $0x124] ss:$24 sps:$4 sm:$0xff]  }
  0x41   :  { %495 = vmatpush1.bf16.xpose.msra.mxu1 %v2480_v6  ;;  %621 = vmatprep.mubr.bf16.mxu0 %v207_v20  ;;  %v2505_v29 = vld [vmem:[#allocation2 + $0xf8] ss:$24 sps:$4 sm:$0xff]   ;;  %v2508_v31 = vld [vmem:[#allocation2 + $0x12c] ss:$24 sps:$4 sm:$0xff]   ;;  %v2511_v33 = vld [vmem:[#allocation2 + $0x128] ss:$24 sps:$4 sm:$0xff]  }
  0x42   :  { %592 = vmatpush1.bf16.xpose.msra.mxu0 %v2481_v7  ;;  %496 = vmatprep.subr.bf16.mxu1 %v2482_v8  ;;  %v2510_v32 = vld [vmem:[#allocation2 + $0x120] ss:$24 sps:$4 sm:$0xff]   ;;  %v2512_v34 = vld [vmem:[#allocation2 + $0x154] ss:$24 sps:$4 sm:$0xff]   ;;  %v2516_v36 = vld [vmem:[#allocation2 + $0x150] ss:$24 sps:$4 sm:$0xff]  }
  0x43   :  { %593 = vmatprep.subr.bf16.mxu0 %v2484_v9  ;;  %v2514_v35 = vld [vmem:[#allocation2 + $0x15c] ss:$24 sps:$4 sm:$0xff]   ;;  %v2517_v37 = vld [vmem:[#allocation2 + $0x158] ss:$24 sps:$4 sm:$0xff]   ;;  %v115_v42 = vld [vmem:[#allocation7 + $0x40] sm:$0xff]  ;;  %vm1206_vm5 = vcmask 1045509  }
  0x44   :  { %v2520_v38 = vld [vmem:[#allocation2 + $0x14] ss:$24 sps:$4 sm:$0xff]   ;;  %v113_v40 = vld [vmem:[#allocation7 + $0x30] sm:$0xff]  ;;  %v126_v44 = vld [vmem:[#allocation7 + $0x98] sm:$0xff]  ;;  %vm1208_vm6 = vcmask 1046534   ;;  %vm1210_vm7 = vcmask 1047559  }
  0x45   :  { %v109_v41 = vld [vmem:[#allocation7 + $0x10] sm:$0xff]  ;;  %v120_v43 = vld [vmem:[#allocation7 + $0x68] sm:$0xff]  ;;  %v122_v45 = vld [vmem:[#allocation7 + $0x78] sm:$0xff]  ;;  %v204_v47 = vpack.c.bf16 %v113_v40, %v107_v39  ;;  %vm1213_vm8 = vcmask 130048  }
  0x46   :  { %v128_v46 = vld [vmem:[#allocation7 + $0xa8] sm:$0xff]  ;;  %v206_v48 = vpack.c.bf16 %v115_v42, %v109_v41  ;;  %v211_v50 = vpack.c.bf16 %v126_v44, %v120_v43  ;;  %v2523_v52 = vld [vmem:[#allocation2 + $0x44] ss:$24 sps:$4 sm:$0xff]   ;;  %v119_v53 = vld [vmem:[#allocation7 + $0x60] sm:$0xff] }
  0x47   :  { %v2518_v49 = vld [vmem:[#allocation2 + $0x10] ss:$24 sps:$4 sm:$0xff]   ;;  %v213_v51 = vpack.c.bf16 %v128_v46, %v122_v45  ;;  %v125_v54 = vld [vmem:[#allocation7 + $0x90] sm:$0xff]  ;;  %v138_v58 = vld [vmem:[#allocation7 + $0xf8] sm:$0xff] }
  0x48   :  { %v121_v55 = vld [vmem:[#allocation7 + $0x70] sm:$0xff]  ;;  %v127_v56 = vld [vmem:[#allocation7 + $0xa0] sm:$0xff]  ;;  %v132_v57 = vld [vmem:[#allocation7 + $0xc8] sm:$0xff]  ;;  %v210_v61 = vpack.c.bf16 %v125_v54, %v119_v53 }
  0x49   :  { %497 = vmatpush1.bf16.xpose.msra.mxu1 %v2486_v10  ;;  %v134_v59 = vld [vmem:[#allocation7 + $0xd8] sm:$0xff]  ;;  %v140_v60 = vld [vmem:[#allocation7 + $0x108] sm:$0xff]  ;;  %v212_v62 = vpack.c.bf16 %v127_v56, %v121_v55  ;;  %v217_v0 = vpack.c.bf16 %v138_v58, %v132_v57  ;;  %v131_v3 = vld [vmem:[#allocation7 + $0xc0] sm:$0xff] }
  0x4a   :  { %594 = vmatpush1.bf16.xpose.msra.mxu0 %v2487_v11  ;;  %498 = vmatprep.subr.bf16.mxu1 %v2488_v12  ;;  %v2521_v63 = vld [vmem:[#allocation2 + $0x40] ss:$24 sps:$4 sm:$0xff]   ;;  %v219_v1 = vpack.c.bf16 %v140_v60, %v134_v59  ;;  %v2526_v2 = vld [vmem:[#allocation2 + $0x74] ss:$24 sps:$4 sm:$0xff]   ;;  %v2529_v16 = vld [vmem:[#allocation2 + $0xa4] ss:$24 sps:$4 sm:$0xff]  }
  0x4b   :  { %595 = vmatprep.subr.bf16.mxu0 %v2490_v13  ;;  %v137_v4 = vld [vmem:[#allocation7 + $0xf0] sm:$0xff]  ;;  %v139_v6 = vld [vmem:[#allocation7 + $0x100] sm:$0xff]  ;;  %v144_v7 = vld [vmem:[#allocation7 + $0x128] sm:$0xff] }
  0x4c   :  { %v133_v5 = vld [vmem:[#allocation7 + $0xd0] sm:$0xff]  ;;  %v150_v8 = vld [vmem:[#allocation7 + $0x158] sm:$0xff]  ;;  %v152_v10 = vld [vmem:[#allocation7 + $0x168] sm:$0xff]  ;;  %v216_v11 = vpack.c.bf16 %v137_v4, %v131_v3 }
  0x4d   :  { %v146_v9 = vld [vmem:[#allocation7 + $0x138] sm:$0xff]  ;;  %v218_v12 = vpack.c.bf16 %v139_v6, %v133_v5  ;;  %v2524_v13 = vld [vmem:[#allocation2 + $0x70] ss:$24 sps:$4 sm:$0xff]   ;;  %v223_v14 = vpack.c.bf16 %v150_v8, %v144_v7  ;;  %v149_v18 = vld [vmem:[#allocation7 + $0x150] sm:$0xff] }
  0x4e   :  { %v225_v15 = vpack.c.bf16 %v152_v10, %v146_v9  ;;  %v143_v17 = vld [vmem:[#allocation7 + $0x120] sm:$0xff]  ;;  %v2535_v44 = vld [vmem:[#allocation2 + $0x104] ss:$24 sps:$4 sm:$0xff]   ;;  %v2533_v55 = vld [vmem:[#allocation2 + $0x100] ss:$24 sps:$4 sm:$0xff]  }
  0x4f   :  { %v151_v20 = vld [vmem:[#allocation7 + $0x160] sm:$0xff]  ;;  %v173_v46 = vld [vmem:[#allocation7 + $0x210] sm:$0xff] }
  0x50   :  { %v2530_v41 = vld [vmem:[#allocation2 + $0xd0] ss:$24 sps:$4 sm:$0xff]   ;;  %v2538_v58 = vld [vmem:[#allocation2 + $0x134] ss:$24 sps:$4 sm:$0xff]   ;;  %v185_v60 = vld [vmem:[#allocation7 + $0x270] sm:$0xff] }
  0x51   :  { %499 = vmatpush1.bf16.xpose.msra.mxu1 %v2492_v19  ;;  %v145_v19 = vld [vmem:[#allocation7 + $0x130] sm:$0xff]  ;;  %v167_v45 = vld [vmem:[#allocation7 + $0x1e0] sm:$0xff] }
  0x52   :  { %596 = vmatpush1.bf16.xpose.msra.mxu0 %v2493_v21  ;;  %500 = vmatprep.subr.bf16.mxu1 %v2494_v22  ;;  %v156_v21 = vld [vmem:[#allocation7 + $0x188] sm:$0xff]  ;;  %v162_v22 = vld [vmem:[#allocation7 + $0x1b8] sm:$0xff]  ;;  %v234_v53 = vpack.c.bf16 %v173_v46, %v167_v45  ;;  %v179_v59 = vld [vmem:[#allocation7 + $0x240] sm:$0xff] }
  0x53   :  { %597 = vmatprep.subr.bf16.mxu0 %v2496_v23  ;;  %v158_v23 = vld [vmem:[#allocation7 + $0x198] sm:$0xff]  ;;  %v240_v3 = vpack.c.bf16 %v185_v60, %v179_v59  ;;  %v2536_v5 = vld [vmem:[#allocation2 + $0x130] ss:$24 sps:$4 sm:$0xff]   ;;  %v197_v10 = vld [vmem:[#allocation7 + $0x2d0] sm:$0xff] }
  0x54   :  { %v2541_v8 = vld [vmem:[#allocation2 + $0x164] ss:$24 sps:$4 sm:$0xff]   ;;  %v191_v9 = vld [vmem:[#allocation7 + $0x2a0] sm:$0xff] }
  0x55   :  { %v135_v46 = vld [vmem:[#allocation7 + $0xe0] sm:$0xff]  ;;  %v153_v59 = vld [vmem:[#allocation7 + $0x170] sm:$0xff] }
  0x56   :  { %v195_v60 = vld [vmem:[#allocation7 + $0x2c0] sm:$0xff] }
  0x59   :  { %501 = vmatpush1.bf16.xpose.msra.mxu1 %v2498_v24  ;;  %v164_v24 = vld [vmem:[#allocation7 + $0x1c8] sm:$0xff] }
  0x5a   :  { %598 = vmatpush1.bf16.xpose.msra.mxu0 %v2499_v25  ;;  %502 = vmatprep.subr.bf16.mxu1 %v2500_v26  ;;  %v222_v25 = vpack.c.bf16 %v149_v18, %v143_v17  ;;  %v224_v26 = vpack.c.bf16 %v151_v20, %v145_v19  ;;  %v246_v17 = vpack.c.bf16 %v197_v10, %v191_v9  ;;  %v2539_v19 = vld [vmem:[#allocation2 + $0x160] ss:$24 sps:$4 sm:$0xff]  }
  0x5b   :  { %599 = vmatprep.subr.bf16.mxu0 %v2502_v27  ;;  %v2527_v27 = vld [vmem:[#allocation2 + $0xa0] ss:$24 sps:$4 sm:$0xff]  }
  0x61   :  { %503 = vmatpush1.bf16.xpose.msra.mxu1 %v2504_v28  ;;  %v229_v28 = vpack.c.bf16 %v162_v22, %v156_v21  ;;  %v111_v22 = vld [vmem:[#allocation7 + $0x20] sm:$0xff] }
  0x62   :  { %600 = vmatpush1.bf16.xpose.msra.mxu0 %v2505_v29  ;;  %504 = vmatprep.subr.bf16.mxu1 %v2506_v30  ;;  %v231_v29 = vpack.c.bf16 %v164_v24, %v158_v23  ;;  %v2532_v30 = vld [vmem:[#allocation2 + $0xd4] ss:$24 sps:$4 sm:$0xff]   ;;  %v117_v23 = vld [vmem:[#allocation7 + $0x50] sm:$0xff] }
  0x63   :  { %601 = vmatprep.subr.bf16.mxu0 %v2508_v31  ;;  %v155_v31 = vld [vmem:[#allocation7 + $0x180] sm:$0xff] }
  0x64   :  { %v159_v24 = vld [vmem:[#allocation7 + $0x1a0] sm:$0xff] }
  0x69   :  { %505 = vmatpush1.bf16.xpose.msra.mxu1 %v2510_v32  ;;  %v161_v32 = vld [vmem:[#allocation7 + $0x1b0] sm:$0xff] }
  0x6a   :  { %602 = vmatpush1.bf16.xpose.msra.mxu0 %v2511_v33  ;;  %506 = vmatprep.subr.bf16.mxu1 %v2512_v34  ;;  %v157_v33 = vld [vmem:[#allocation7 + $0x190] sm:$0xff]  ;;  %v163_v34 = vld [vmem:[#allocation7 + $0x1c0] sm:$0xff]  ;;  %v228_v39 = vpack.c.bf16 %v161_v32, %v155_v31 }
  0x6b   :  { %603 = vmatprep.subr.bf16.mxu0 %v2514_v35  ;;  %v168_v35 = vld [vmem:[#allocation7 + $0x1e8] sm:$0xff]  ;;  %v230_v40 = vpack.c.bf16 %v163_v34, %v157_v33  ;;  %v123_v34 = vld [vmem:[#allocation7 + $0x80] sm:$0xff] }
  0x71   :  { %507 = vmatpush1.bf16.xpose.msra.mxu1 %v2516_v36  ;;  %v174_v36 = vld [vmem:[#allocation7 + $0x218] sm:$0xff] }
  0x72   :  { %604 = vmatpush1.bf16.xpose.msra.mxu0 %v2517_v37  ;;  %2402 = vmatprep.subr.bf16.mxu1 %v2520_v38  ;;  %v170_v37 = vld [vmem:[#allocation7 + $0x1f8] sm:$0xff]  ;;  %v235_v42 = vpack.c.bf16 %v174_v36, %v168_v35  ;;  %v129_v35 = vld [vmem:[#allocation7 + $0xb0] sm:$0xff]  ;;  %v171_v36 = vld [vmem:[#allocation7 + $0x200] sm:$0xff] }
  0x73   :  { %686 = vmatprep.subr.bf16.mxu0 %v2520_v38  ;;  %v176_v38 = vld [vmem:[#allocation7 + $0x228] sm:$0xff] }
  0x74   :  { %v237_v43 = vpack.c.bf16 %v176_v38, %v170_v37  ;;  %v177_v37 = vld [vmem:[#allocation7 + $0x230] sm:$0xff]  ;;  %v136_v38 = vld [vmem:[#allocation7 + $0xe8] sm:$0xff] }
  0x78   :  { %525 = vmatmul.mubr.bf16.vlgmr.msra.gmra.mrb[0].mxu1 %v204_v47  ;;  %v169_v47 = vld [vmem:[#allocation7 + $0x1f0] sm:$0xff] }
  0x79   :  { %622 = vmatmul.mubr.bf16.vlgmr.msra.gmra.mrb[0].mxu0 %v206_v48  ;;  %2410 = vmatpush1.bf16.xpose.msra.mxu1 %v2518_v49  ;;  %v175_v48 = vld [vmem:[#allocation7 + $0x220] sm:$0xff] }
  0x7a   :  { %687 = vmatpush1.bf16.xpose.msra.mxu0 %v2518_v49  ;;  %532 = vmatprep.mubr.bf16.mxu1 %v211_v50  ;;  %v180_v49 = vld [vmem:[#allocation7 + $0x248] sm:$0xff]  ;;  %v186_v50 = vld [vmem:[#allocation7 + $0x278] sm:$0xff]  ;;  %v236_v54 = vpack.c.bf16 %v175_v48, %v169_v47  ;;  %v141_v47 = vld [vmem:[#allocation7 + $0x110] sm:$0xff] }
  0x7b   :  { %629 = vmatprep.mubr.bf16.mxu0 %v213_v51  ;;  %688 = vmatprep.subr.bf16.mxu0 %v2523_v52  ;;  %v182_v51 = vld [vmem:[#allocation7 + $0x258] sm:$0xff]  ;;  %v241_v56 = vpack.c.bf16 %v186_v50, %v180_v49  ;;  %v183_v48 = vld [vmem:[#allocation7 + $0x260] sm:$0xff]  ;;  %v189_v49 = vld [vmem:[#allocation7 + $0x290] sm:$0xff] }
  0x7c   :  { %2403 = vmatprep.subr.bf16.mxu1 %v2523_v52  ;;  %v188_v52 = vld [vmem:[#allocation7 + $0x288] sm:$0xff] }
  0x7d   :  { %v243_v57 = vpack.c.bf16 %v188_v52, %v182_v51  ;;  %v148_v50 = vld [vmem:[#allocation7 + $0x148] sm:$0xff]  ;;  %v154_v51 = vld [vmem:[#allocation7 + $0x178] sm:$0xff] }
  0x7e   :  { %v196_v52 = vld [vmem:[#allocation7 + $0x2c8] sm:$0xff] }
  0x80   :  { %533 = vmatmul.mubr.bf16.gmra.mrb[4].mxu1 %v210_v61  ;;  %v181_v61 = vld [vmem:[#allocation7 + $0x250] sm:$0xff] }
  0x81   :  { %630 = vmatmul.mubr.bf16.gmra.mrb[4].mxu0 %v212_v62  ;;  %2411 = vmatpush1.bf16.xpose.msra.mxu1 %v2521_v63  ;;  %v187_v62 = vld [vmem:[#allocation7 + $0x280] sm:$0xff] }
  0x82   :  { %689 = vmatpush1.bf16.xpose.msra.mxu0 %v2521_v63  ;;  %540 = vmatprep.mubr.bf16.mxu1 %v217_v0  ;;  %v192_v63 = vld [vmem:[#allocation7 + $0x2a8] sm:$0xff]  ;;  %v198_v0 = vld [vmem:[#allocation7 + $0x2d8] sm:$0xff]  ;;  %v242_v4 = vpack.c.bf16 %v187_v62, %v181_v61  ;;  %v201_v61 = vld [vmem:[#allocation7 + $0x2f0] sm:$0xff] }
  0x83   :  { %637 = vmatprep.mubr.bf16.mxu0 %v219_v1  ;;  %690 = vmatprep.subr.bf16.mxu0 %v2526_v2  ;;  %v194_v1 = vld [vmem:[#allocation7 + $0x2b8] sm:$0xff]  ;;  %v247_v6 = vpack.c.bf16 %v198_v0, %v192_v63  ;;  %v250_v63 = vpack.c.bf16 %v201_v61, %v195_v60  ;;  %v804_v0 = vlaneseq }
  0x84   :  { %2404 = vmatprep.subr.bf16.mxu1 %v2526_v2  ;;  %v200_v2 = vld [vmem:[#allocation7 + $0x2e8] sm:$0xff] }
  0x85   :  { %v249_v7 = vpack.c.bf16 %v200_v2, %v194_v1  ;;  %v2878_v1 = vshrl.u32 %v804_v0, 7 }
  0x87   :  { %v2881_v2 = vsub.s32 0, %v2878_v1  ;;  %v2901_v9 = vsub.s32 3, %v2878_v1 }
  0x88   :  { %541 = vmatmul.mubr.bf16.gmra.mrb[8].mxu1 %v216_v11  ;;  %v193_v11 = vld [vmem:[#allocation7 + $0x2b0] sm:$0xff] }
  0x89   :  { %638 = vmatmul.mubr.bf16.gmra.mrb[8].mxu0 %v218_v12  ;;  %2412 = vmatpush1.bf16.xpose.msra.mxu1 %v2524_v13  ;;  %v199_v12 = vld [vmem:[#allocation7 + $0x2e0] sm:$0xff] }
  0x8a   :  { %691 = vmatpush1.bf16.xpose.msra.mxu0 %v2524_v13  ;;  %548 = vmatprep.mubr.bf16.mxu1 %v223_v14  ;;  %v112_v13 = vld [vmem:[#allocation7 + $0x28] sm:$0xff]  ;;  %v118_v14 = vld [vmem:[#allocation7 + $0x58] sm:$0xff]  ;;  %v248_v18 = vpack.c.bf16 %v199_v12, %v193_v11  ;;  %v2906_v11 = vsub.s32 4, %v2878_v1 }
  0x8b   :  { %645 = vmatprep.mubr.bf16.mxu0 %v225_v15  ;;  %692 = vmatprep.subr.bf16.mxu0 %v2529_v16  ;;  %v160_v15 = vld [vmem:[#allocation7 + $0x1a8] sm:$0xff]  ;;  %v209_v20 = vpack.c.bf16 %v118_v14, %v112_v13  ;;  %v2911_v13 = vsub.s32 5, %v2878_v1 }
  0x8c   :  { %2405 = vmatprep.subr.bf16.mxu1 %v2529_v16  ;;  %v166_v16 = vld [vmem:[#allocation7 + $0x1d8] sm:$0xff] }
  0x8d   :  { %v233_v21 = vpack.c.bf16 %v166_v16, %v160_v15  ;;  %v2916_v15 = vsub.s32 6, %v2878_v1 }
  0x90   :  { %549 = vmatmul.mubr.bf16.gmra.mrb[12].mxu1 %v222_v25  ;;  %v165_v25 = vld [vmem:[#allocation7 + $0x1d0] sm:$0xff] }
  0x91   :  { %646 = vmatmul.mubr.bf16.gmra.mrb[12].mxu0 %v224_v26  ;;  %2413 = vmatpush1.bf16.xpose.msra.mxu1 %v2527_v27  ;;  %v124_v26 = vld [vmem:[#allocation7 + $0x88] sm:$0xff]  ;;  %v232_v31 = vpack.c.bf16 %v165_v25, %v159_v24 }
  0x92   :  { %693 = vmatpush1.bf16.xpose.msra.mxu0 %v2527_v27  ;;  %556 = vmatprep.mubr.bf16.mxu1 %v229_v28  ;;  %v130_v27 = vld [vmem:[#allocation7 + $0xb8] sm:$0xff]  ;;  %v172_v28 = vld [vmem:[#allocation7 + $0x208] sm:$0xff] }
  0x93   :  { %653 = vmatprep.mubr.bf16.mxu0 %v231_v29  ;;  %694 = vmatprep.subr.bf16.mxu0 %v2532_v30  ;;  %v178_v29 = vld [vmem:[#allocation7 + $0x238] sm:$0xff]  ;;  %v215_v32 = vpack.c.bf16 %v130_v27, %v124_v26 }
  0x94   :  { %2406 = vmatprep.subr.bf16.mxu1 %v2532_v30  ;;  %v208_v30 = vpack.c.bf16 %v117_v23, %v111_v22  ;;  %v239_v33 = vpack.c.bf16 %v178_v29, %v172_v28 }
  0x98   :  { %557 = vmatmul.mubr.bf16.gmra.mrb[16].mxu1 %v228_v39  ;;  %v142_v39 = vld [vmem:[#allocation7 + $0x118] sm:$0xff] }
  0x99   :  { %654 = vmatmul.mubr.bf16.gmra.mrb[16].mxu0 %v230_v40  ;;  %2414 = vmatpush1.bf16.xpose.msra.mxu1 %v2530_v41  ;;  %v184_v40 = vld [vmem:[#allocation7 + $0x268] sm:$0xff] }
  0x9a   :  { %695 = vmatpush1.bf16.xpose.msra.mxu0 %v2530_v41  ;;  %564 = vmatprep.mubr.bf16.mxu1 %v235_v42  ;;  %v190_v41 = vld [vmem:[#allocation7 + $0x298] sm:$0xff]  ;;  %v214_v42 = vpack.c.bf16 %v129_v35, %v123_v34 }
  0x9b   :  { %661 = vmatprep.mubr.bf16.mxu0 %v237_v43  ;;  %696 = vmatprep.subr.bf16.mxu0 %v2535_v44  ;;  %v238_v43 = vpack.c.bf16 %v177_v37, %v171_v36  ;;  %v245_v45 = vpack.c.bf16 %v190_v41, %v184_v40 }
  0x9c   :  { %2407 = vmatprep.subr.bf16.mxu1 %v2535_v44  ;;  %v221_v44 = vpack.c.bf16 %v142_v39, %v136_v38 }
  0xa0   :  { %565 = vmatmul.mubr.bf16.gmra.mrb[20].mxu1 %v234_v53  ;;  %v202_v53 = vld [vmem:[#allocation7 + $0x2f8] sm:$0xff] }
  0xa1   :  { %662 = vmatmul.mubr.bf16.gmra.mrb[20].mxu0 %v236_v54  ;;  %2415 = vmatpush1.bf16.xpose.msra.mxu1 %v2533_v55  ;;  %v220_v54 = vpack.c.bf16 %v141_v47, %v135_v46 }
  0xa2   :  { %697 = vmatpush1.bf16.xpose.msra.mxu0 %v2533_v55  ;;  %572 = vmatprep.mubr.bf16.mxu1 %v241_v56  ;;  %v244_v55 = vpack.c.bf16 %v189_v49, %v183_v48  ;;  %v227_v56 = vpack.c.bf16 %v154_v51, %v148_v50 }
  0xa3   :  { %669 = vmatprep.mubr.bf16.mxu0 %v243_v57  ;;  %698 = vmatprep.subr.bf16.mxu0 %v2538_v58  ;;  %v251_v57 = vpack.c.bf16 %v202_v53, %v196_v52 }
  0xa4   :  { %2408 = vmatprep.subr.bf16.mxu1 %v2538_v58  ;;  %v147_v58 = vld [vmem:[#allocation7 + $0x140] sm:$0xff] }
  0xa5   :  { %v226_v62 = vpack.c.bf16 %v153_v59, %v147_v58 }
  0xa8   :  { %573 = vmatmul.mubr.bf16.gmra.mrb[24].mxu1 %v240_v3  ;;  %v2886_v3 = vld [vmem:[%s3475_s3] sm:$0xff]  ;;  %s2808_s3 = smov [#allocation8]  }
  0xa9   :  { %670 = vmatmul.mubr.bf16.gmra.mrb[24].mxu0 %v242_v4  ;;  %2416 = vmatpush1.bf16.xpose.msra.mxu1 %v2536_v5  ;;  %v941_v4 = vrot.slane %v2886_v3, %v2881_v2  ;;  %v974_v10 = vrot.slane %v2886_v3, %v2901_v9  ;;  %v985_v12 = vrot.slane %v2886_v3, %v2906_v11  ;;  %s2296_s28 = sshll.u32 %s2808_s3, 4  ;;  %s2297_s28 = int_to_ptr.vmem [resolvable:$true] %s2296_s28 }
  0xaa   :  { %699 = vmatpush1.bf16.xpose.msra.mxu0 %v2536_v5  ;;  %580 = vmatprep.mubr.bf16.mxu1 %v247_v6  ;;  %v2891_v5 = vsub.s32 1, %v2878_v1  ;;  %v996_v14 = vrot.slane %v2886_v3, %v2911_v13  ;;  %v1007_v16 = vrot.slane %v2886_v3, %v2916_v15  ;;  %s2771_s29 = scalar_lea.vmem %s2297_s28, 384  ;;  %p2776_p11 = scmp.lt.s32.totalorder %s2297_s28, %s2297_s28 }
  0xab   :  { %677 = vmatprep.mubr.bf16.mxu0 %v249_v7  ;;  %700 = vmatprep.subr.bf16.mxu0 %v2541_v8  ;;  %v2896_v7 = vsub.s32 2, %v2878_v1  ;;  %p2772_p10 = scmp.ne.s32.totalorder %s2297_s28, %s2771_s29  ;;  %p2777_p12 = scmp.lt.s32.totalorder %s2771_s29, %s2771_s29 }
  0xac   :  { %2409 = vmatprep.subr.bf16.mxu1 %v2541_v8  ;;  %947 = vbcast.lane.b32.xlu1 %v941_v4, 264  ;;  %v952_v6 = vrot.slane %v2886_v3, %v2891_v5 }
  0xad   :  { %943 = vbcast.lane.b32.xlu0 %v941_v4, 256  ;;  %v963_v8 = vrot.slane %v2886_v3, %v2896_v7  ;;  %p2778_p13 = por %p2777_p12, %p2776_p11 }
  0xaf   :  { %p2779_p0 = pnand %p2778_p13, %p2772_p10 }
  0xb0   :  { %581 = vmatmul.mubr.bf16.gmra.mrb[28].mxu1 %v246_v17  ;;  %954 = vbcast.lane.b32.xlu1 %v952_v6, 256 }
  0xb1   :  { %678 = vmatmul.mubr.bf16.gmra.mrb[28].mxu0 %v248_v18  ;;  %2417 = vmatpush1.bf16.xpose.msra.mxu1 %v2539_v19 }
  0xb2   :  { %701 = vmatpush1.bf16.xpose.msra.mxu0 %v2539_v19  ;;  %718 = vmatprep.mubr.bf16.mxu0 %v209_v20 }
  0xb3   :  { %750 = vmatprep.mubr.bf16.mxu1 %v233_v21  ;;  %965 = vbcast.lane.b32.xlu0 %v963_v8, 256 }
  0xb4   :  { %958 = vbcast.lane.b32.xlu1 %v952_v6, 264 }
  0xb7   :  { %976 = vbcast.lane.b32.xlu0 %v974_v10, 256 }
  0xb8   :  { %751 = vmatmul.mubr.bf16.vlgmr.msra.gmra.mrb[32].mxu1 %v232_v31  ;;  %969 = vbcast.lane.b32.xlu1 %v963_v8, 264 }
  0xb9   :  { %719 = vmatmul.mubr.bf16.vlgmr.msra.gmra.mrb[0].mxu0 %v208_v30  ;;  %758 = vmatprep.mubr.bf16.mxu1 %v239_v33 }
  0xba   :  { %726 = vmatprep.mubr.bf16.mxu0 %v215_v32 }
  0xbb   :  { %987 = vbcast.lane.b32.xlu0 %v985_v12, 256 }
  0xbc   :  { %980 = vbcast.lane.b32.xlu1 %v974_v10, 264 }
  0xbf   :  { %998 = vbcast.lane.b32.xlu0 %v996_v14, 256 }
  0xc0   :  { %759 = vmatmul.mubr.bf16.gmra.mrb[36].mxu1 %v238_v43  ;;  %991 = vbcast.lane.b32.xlu1 %v985_v12, 264 }
  0xc1   :  { %727 = vmatmul.mubr.bf16.gmra.mrb[4].mxu0 %v214_v42  ;;  %766 = vmatprep.mubr.bf16.mxu1 %v245_v45 }
  0xc2   :  { %734 = vmatprep.mubr.bf16.mxu0 %v221_v44 }
  0xc3   :  { %1009 = vbcast.lane.b32.xlu0 %v1007_v16, 256 }
  0xc4   :  { %1002 = vbcast.lane.b32.xlu1 %v996_v14, 264 }
  0xc8   :  { %767 = vmatmul.mubr.bf16.gmra.mrb[40].mxu1 %v244_v55  ;;  %1013 = vbcast.lane.b32.xlu1 %v1007_v16, 264 }
  0xc9   :  { %735 = vmatmul.mubr.bf16.gmra.mrb[8].mxu0 %v220_v54  ;;  %774 = vmatprep.mubr.bf16.mxu1 %v251_v57 }
  0xca   :  { %742 = vmatprep.mubr.bf16.mxu0 %v227_v56 }
  0xd0   :  { %775 = vmatmul.mubr.bf16.gmra.mrb[44].mxu1 %v250_v63  ;;  %v2806_v63 = vmov 1966171168  }
  0xd1   :  { %743 = vmatmul.mubr.bf16.gmra.mrb[12].mxu0 %v226_v62  ;;  %v802_v4 = vunpack.c.l.s4 %v2806_v63 }
 0x14b   :  { %v2920_v17 = vpop.f32.mrb[0].mxu1 }
 0x14c   :  { %v528_v18 = vpop.f32.mrb[1].mxu1 }
 0x14d   :  { %v2922_v19 = vpop.f32.mrb[2].mxu1 }
 0x14e   :  { %v531_v20 = vpop.f32.mrb[3].mxu1 }
 0x14f   :  { %v803_v20 = vunpack.c.0.s8 %v802_v4 }
 0x153   :  { %v2924_v21 = vpop.f32.mrb[4].mxu1 }
 0x154   :  { %v536_v22 = vpop.f32.mrb[5].mxu1 }
 0x155   :  { %v2926_v23 = vpop.f32.mrb[6].mxu1 }
 0x156   :  { %v539_v24 = vpop.f32.mrb[7].mxu1 }
 0x15b   :  { %v2928_v25 = vpop.f32.mrb[8].mxu1 }
 0x15c   :  { %v544_v26 = vpop.f32.mrb[9].mxu1 }
 0x15d   :  { %v2930_v27 = vpop.f32.mrb[10].mxu1 }
 0x15e   :  { %v547_v28 = vpop.f32.mrb[11].mxu1 }
 0x15f   :  { %v806_v28 = vsub.s32 %v803_v20, %v2878_v1 }
 0x163   :  { %v2932_v29 = vpop.f32.mrb[12].mxu1 }
 0x164   :  { %v552_v30 = vpop.f32.mrb[13].mxu1 }
 0x165   :  { %v2934_v31 = vpop.f32.mrb[14].mxu1  ;;  %v106_v30 = vld [vmem:[#allocation5] sm:$0xff] }
 0x166   :  { %v555_v32 = vpop.f32.mrb[15].mxu1 }
 0x16b   :  { %v558_v33 = vpop.f32.mrb[16].mxu1 }
 0x16c   :  { %v655_v34 = vpop.f32.mrb[16].mxu0  ;;  %v560_v36 = vpop.f32.mrb[17].mxu1 }
 0x16d   :  { %v656_v35 = vadd.f32 %v655_v34, %v558_v33  ;;  %v657_v37 = vpop.f32.mrb[17].mxu0  ;;  %v561_v38 = vpop.f32.mrb[18].mxu1 }
 0x16e   :  { %v658_v39 = vpop.f32.mrb[18].mxu0  ;;  %v563_v41 = vpop.f32.mrb[19].mxu1 }
 0x16f   :  { %v659_v40 = vadd.f32 %v658_v39, %v561_v38  ;;  %v660_v42 = vpop.f32.mrb[19].mxu0 }
 0x170   :  { %v807_v42 = vrot.slane %v106_v30, %v806_v28 }
 0x173   :  { %v566_v43 = vpop.f32.mrb[20].mxu1 }
 0x174   :  { %v663_v44 = vpop.f32.mrb[20].mxu0  ;;  %v568_v46 = vpop.f32.mrb[21].mxu1 }
 0x175   :  { %v664_v45 = vadd.f32 %v663_v44, %v566_v43  ;;  %v665_v47 = vpop.f32.mrb[21].mxu0  ;;  %v569_v48 = vpop.f32.mrb[22].mxu1  ;;  %v800_v43 = vcombine.high %v106_v30, %v106_v30 }
 0x176   :  { %v666_v49 = vpop.f32.mrb[22].mxu0  ;;  %v571_v51 = vpop.f32.mrb[23].mxu1 }
 0x177   :  { %v667_v50 = vadd.f32 %v666_v49, %v569_v48  ;;  %v668_v52 = vpop.f32.mrb[23].mxu0  ;;  %v2947_v49 = vrot.slane %v807_v42, %v806_v28  ;;  %v814_v51 = vrot.slane %v800_v43, %v806_v28 }
 0x17b   :  { %v574_v53 = vpop.f32.mrb[24].mxu1 }
 0x17c   :  { %v671_v54 = vpop.f32.mrb[24].mxu0  ;;  %v576_v56 = vpop.f32.mrb[25].mxu1 }
 0x17d   :  { %v2936_v55 = vadd.f32 %v671_v54, %v574_v53  ;;  %v673_v57 = vpop.f32.mrb[25].mxu0  ;;  %v577_v58 = vpop.f32.mrb[26].mxu1 }
 0x17e   :  { %v674_v59 = vpop.f32.mrb[26].mxu0  ;;  %v579_v61 = vpop.f32.mrb[27].mxu1 }
 0x17f   :  { %v2938_v60 = vadd.f32 %v674_v59, %v577_v58  ;;  %v676_v62 = vpop.f32.mrb[27].mxu0  ;;  %v815_v59 = vcombine.high %v807_v42, %v807_v42 }
 0x183   :  { %v582_v6 = vpop.f32.mrb[28].mxu1 }
 0x184   :  { %v679_v8 = vpop.f32.mrb[28].mxu0  ;;  %v584_v12 = vpop.f32.mrb[29].mxu1 }
 0x185   :  { %v2940_v10 = vadd.f32 %v679_v8, %v582_v6  ;;  %v681_v14 = vpop.f32.mrb[29].mxu0  ;;  %v585_v16 = vpop.f32.mrb[30].mxu1  ;;  %v2957_v8 = vrot.slane %v815_v59, %v806_v28  ;;  %v816_v12 = vcombine.high %v814_v51, %v814_v51 }
 0x186   :  { %v682_v18 = vpop.f32.mrb[30].mxu0  ;;  %v587_v24 = vpop.f32.mrb[31].mxu1 }
 0x187   :  { %v2942_v22 = vadd.f32 %v682_v18, %v585_v16  ;;  %v684_v26 = vpop.f32.mrb[31].mxu0 }
 0x18b   :  { %v752_v33 = vpop.f32.mrb[32].mxu1 }
 0x18c   :  { %v720_v32 = vpop.f32.mrb[0].mxu0  ;;  %v753_v36 = vadd.f32 %v752_v33, %v656_v35  ;;  %v754_v38 = vpop.f32.mrb[33].mxu1 }
 0x18d   :  { %v2418_v34 = vadd.f32 %v720_v32, %v2920_v17  ;;  %v722_v37 = vpop.f32.mrb[1].mxu0  ;;  %v755_v41 = vpop.f32.mrb[34].mxu1 }
 0x18e   :  { %v723_v39 = vpop.f32.mrb[2].mxu0  ;;  %v756_v46 = vadd.f32 %v755_v41, %v659_v40  ;;  %v757_v48 = vpop.f32.mrb[35].mxu1  ;;  %v2952_v40 = vrot.slane %v814_v51, %v806_v28  ;;  %v2963_v37 = vrot.slane %v816_v12, %v806_v28  ;;  %v2807_v12 = vmov 0  }
 0x18f   :  { %2543 = vtanh.f32 %v2418_v34  ;;  %v2419_v44 = vadd.f32 %v723_v39, %v2922_v19  ;;  %v725_v47 = vpop.f32.mrb[3].mxu0  ;;  %v852_v19 = vrot.slane %v2947_v49, %v2881_v2  ;;  %2468 = vset.pattern.permute.xlu0 %v2807_v12  ;;  %2469 = vset.pattern.permute.xlu1 %v2807_v12 }
 0x190   :  { %2545 = vtanh.f32 %v753_v36  ;;  %v856_v36 = vrot.slane %v2957_v8, %v2881_v2  ;;  %v872_v28 = vrot.slane %v2963_v37, %v2881_v2  ;;  %v845_v47 = vcombine.high %v2947_v49, %v2947_v49 }
 0x191   :  { %2547 = vtanh.f32 %v756_v46 }
 0x192   :  { %2549 = vtanh.f32 %v2419_v44  ;;  %v860_v49 = vrot.slane %v845_v47, %v2881_v2 }
 0x193   :  { %v760_v17 = vpop.f32.mrb[36].mxu1 }
 0x194   :  { %v728_v52 = vpop.f32.mrb[4].mxu0  ;;  %v761_v53 = vadd.f32 %v760_v17, %v664_v45  ;;  %v762_v56 = vpop.f32.mrb[37].mxu1  ;;  %v868_v45 = vrot.slane %v2952_v40, %v2881_v2 }
 0x195   :  { %v2420_v35 = vadd.f32 %v728_v52, %v2924_v21  ;;  %v730_v54 = vpop.f32.mrb[5].mxu0  ;;  %v763_v58 = vpop.f32.mrb[38].mxu1 }
 0x196   :  { %v731_v57 = vpop.f32.mrb[6].mxu0  ;;  %v764_v62 = vadd.f32 %v763_v58, %v667_v50  ;;  %v765_v4 = vpop.f32.mrb[39].mxu1 }
 0x197   :  { %2551 = vtanh.f32 %v2420_v35  ;;  %v2421_v61 = vadd.f32 %v731_v57, %v2926_v23  ;;  %v733_v63 = vpop.f32.mrb[7].mxu0 }
 0x198   :  { %2553 = vtanh.f32 %v761_v53  ;;  %v846_v53 = vcombine.high %v2952_v40, %v2952_v40 }
 0x199   :  { %v2544_v6 = vpop.eup %2543  ;;  %2555 = vtanh.f32 %v2421_v61 }
 0x19a   :  { %v889_v21 = vmul.f32 %v2544_v6, %v852_v19  ;;  %v2546_v14 = vpop.eup %2545  ;;  %2557 = vtanh.f32 %v764_v62  ;;  %v876_v40 = vrot.slane %v846_v53, %v2881_v2 }
 0x19b   :  { %v2548_v16 = vpop.eup %2547  ;;  %v768_v20 = vpop.f32.mrb[40].mxu1  ;;  %v897_v34 = vmul.f32 %v2546_v14, %v868_v45 }
 0x19c   :  { %v736_v18 = vpop.f32.mrb[8].mxu0  ;;  %905 = vadd.xlane.f32.xlu0 %v889_v21  ;;  %v769_v50 = vadd.f32 %v768_v20, %v2936_v55  ;;  %v770_v26 = vpop.f32.mrb[41].mxu1  ;;  %v898_v30 = vmul.f32 %v2548_v16, %v868_v45  ;;  %v847_v21 = vcombine.high %v2957_v8, %v2957_v8  ;;  %v848_v16 = vcombine.high %v2963_v37, %v2963_v37 }
 0x19d   :  { %v2422_v23 = vadd.f32 %v736_v18, %v2928_v25  ;;  %v738_v24 = vpop.f32.mrb[9].mxu0  ;;  %v771_v33 = vpop.f32.mrb[42].mxu1 }
 0x19e   :  { %v739_v32 = vpop.f32.mrb[10].mxu0  ;;  %v2550_v38 = vpop.eup %2549  ;;  %v772_v41 = vadd.f32 %v771_v33, %v2938_v60  ;;  %923 = vadd.xlane.f32.xlu1 %v898_v30  ;;  %v864_v14 = vrot.slane %v847_v21, %v2881_v2  ;;  %v880_v24 = vrot.slane %v848_v16, %v2881_v2 }
 0x19f   :  { %2559 = vtanh.f32 %v2422_v23  ;;  %v2423_v39 = vadd.f32 %v739_v32, %v2930_v27  ;;  %v741_v25 = vpop.f32.mrb[11].mxu0  ;;  %v773_v55 = vpop.f32.mrb[43].mxu1  ;;  %v890_v46 = vmul.f32 %v2550_v38, %v852_v19 }
 0x1a0   :  { %2561 = vtanh.f32 %v769_v50  ;;  %921 = vadd.xlane.f32.xlu0 %v897_v34  ;;  %v948_v38 = vpop.permute.xlu1 %947 }
 0x1a1   :  { %v2552_v42 = vpop.eup %2551  ;;  %2563 = vtanh.f32 %v2423_v39 }
 0x1a2   :  { %v2554_v43 = vpop.eup %2553  ;;  %v891_v44 = vmul.f32 %v2552_v42, %v856_v36  ;;  %2565 = vtanh.f32 %v772_v41  ;;  %v944_v41 = vpop.permute.xlu0 %943 }
 0x1a3   :  { %v2556_v48 = vpop.eup %2555  ;;  %v776_v51 = vpop.f32.mrb[44].mxu1  ;;  %v899_v58 = vmul.f32 %v2554_v43, %v872_v28 }
 0x1a4   :  { %v744_v27 = vpop.f32.mrb[12].mxu0  ;;  %909 = vadd.xlane.f32.xlu1 %v891_v44  ;;  %907 = vadd.xlane.f32.xlu0 %v890_v46  ;;  %v777_v52 = vadd.f32 %v776_v51, %v2940_v10  ;;  %v778_v35 = vpop.f32.mrb[45].mxu1  ;;  %v892_v57 = vmul.f32 %v2556_v48, %v856_v36  ;;  %v2986_v36 = vsub.s32 7, %v2878_v1 }
 0x1a5   :  { %v2424_v60 = vadd.f32 %v744_v27, %v2932_v29  ;;  %v746_v17 = vpop.f32.mrb[13].mxu0  ;;  %v779_v56 = vpop.f32.mrb[46].mxu1 }
 0x1a6   :  { %v747_v54 = vpop.f32.mrb[14].mxu0  ;;  %v2558_v19 = vpop.eup %2557  ;;  %v780_v61 = vadd.f32 %v779_v56, %v2942_v22  ;;  %v1018_v37 = vrot.slane %v2886_v3, %v2986_v36 }
 0x1a7   :  { %2567 = vtanh.f32 %v2424_v60  ;;  %v2425_v59 = vadd.f32 %v747_v54, %v2934_v31  ;;  %v749_v29 = vpop.f32.mrb[15].mxu0  ;;  %v781_v62 = vpop.f32.mrb[47].mxu1  ;;  %v900_v4 = vmul.f32 %v2558_v19, %v872_v28 }
 0x1a8   :  { %2569 = vtanh.f32 %v777_v52  ;;  %911 = vadd.xlane.f32.xlu1 %v892_v57  ;;  %925 = vadd.xlane.f32.xlu0 %v899_v58  ;;  %v955_v39 = vpop.permute.xlu1 %954  ;;  %v966_v55 = vpop.permute.xlu0 %965 }
 0x1a9   :  { %v2560_v10 = vpop.eup %2559  ;;  %2571 = vtanh.f32 %v2425_v59 }
 0x1aa   :  { %v2562_v63 = vpop.eup %2561  ;;  %v893_v6 = vmul.f32 %v2560_v10, %v860_v49  ;;  %2573 = vtanh.f32 %v780_v61 }
 0x1ab   :  { %v2564_v45 = vpop.eup %2563  ;;  %v901_v22 = vmul.f32 %v2562_v63, %v876_v40 }
 0x1ac   :  { %927 = vadd.xlane.f32.xlu1 %v900_v4  ;;  %913 = vadd.xlane.f32.xlu0 %v893_v6  ;;  %v894_v31 = vmul.f32 %v2564_v45, %v860_v49  ;;  %v2566_v18 = vpop.eup %2565  ;;  %v959_v25 = vpop.permute.xlu1 %958 }
 0x1ad   :  { %v902_v8 = vmul.f32 %v2566_v18, %v876_v40  ;;  %v977_v43 = vpop.permute.xlu0 %976 }
 0x1b0   :  { %915 = vadd.xlane.f32.xlu1 %v894_v31  ;;  %929 = vadd.xlane.f32.xlu0 %v901_v22  ;;  %v970_v42 = vpop.permute.xlu1 %969 }
 0x1b1   :  { %v2568_v20 = vpop.eup %2567  ;;  %v988_v46 = vpop.permute.xlu0 %987 }
 0x1b2   :  { %v2570_v23 = vpop.eup %2569  ;;  %v895_v50 = vmul.f32 %v2568_v20, %v864_v14 }
 0x1b3   :  { %v2572_v26 = vpop.eup %2571  ;;  %v903_v32 = vmul.f32 %v2570_v23, %v880_v24 }
 0x1b4   :  { %931 = vadd.xlane.f32.xlu1 %v902_v8  ;;  %917 = vadd.xlane.f32.xlu0 %v895_v50  ;;  %v896_v30 = vmul.f32 %v2572_v26, %v864_v14  ;;  %v2574_v33 = vpop.eup %2573  ;;  %v981_v44 = vpop.permute.xlu1 %980 }
 0x1b5   :  { %v904_v34 = vmul.f32 %v2574_v33, %v880_v24  ;;  %v999_v47 = vpop.permute.xlu0 %998 }
 0x1b8   :  { %919 = vadd.xlane.f32.xlu1 %v896_v30  ;;  %933 = vadd.xlane.f32.xlu0 %v903_v32  ;;  %v992_v28 = vpop.permute.xlu1 %991 }
 0x1b9   :  { %v1010_v27 = vpop.permute.xlu0 %1009 }
 0x1bc   :  { %935 = vadd.xlane.f32.xlu1 %v904_v34  ;;  %v1003_v48 = vpop.permute.xlu1 %1002 }
 0x1c0   :  { %v1014_v51 = vpop.permute.xlu1 %1013 }
 0x1cd   :  { %1024 = vbcast.lane.b32.xlu1 %v1018_v37, 264 }
 0x1ce   :  { %1020 = vbcast.lane.b32.xlu0 %v1018_v37, 256 }
 0x229   :  { %v906_v60 = vpop.xlane.xlu0 %905 }
 0x22a   :  { %v2990_v52 = vadd.f32 %v944_v41, %v906_v60 }
 0x22b   :  { %v924_v3 = vpop.xlane.xlu1 %923 }
 0x22c   :  { %1075 = vperm.xlu0 %2468, %v2990_v52   ;;  %v2993_v35 = vadd.f32 %v992_v28, %v924_v3 }
 0x22d   :  { %v922_v17 = vpop.xlane.xlu0 %921 }
 0x22e   :  { %v2995_v53 = vadd.f32 %v988_v46, %v922_v17 }
 0x230   :  { %1102 = vperm.xlu0 %2468, %v2993_v35   ;;  %1099 = vperm.xlu1 %2469, %v2995_v53  }
 0x231   :  { %v910_v54 = vpop.xlane.xlu1 %909  ;;  %v908_v56 = vpop.xlane.xlu0 %907 }
 0x232   :  { %v2999_v57 = vadd.f32 %v948_v38, %v908_v56  ;;  %v3002_v19 = vadd.f32 %v955_v39, %v910_v54  ;;  %v1123_v38 = vand.u32 127, %v804_v0 }
 0x234   :  { %1078 = vperm.xlu1 %2469, %v2999_v57  }
 0x235   :  { %v912_v58 = vpop.xlane.xlu1 %911  ;;  %v926_v49 = vpop.xlane.xlu0 %925 }
 0x236   :  { %v3004_v59 = vadd.f32 %v959_v25, %v912_v58  ;;  %v3008_v62 = vadd.f32 %v999_v47, %v926_v49  ;;  %v1128_v25 = vadd.s32 4294967288, %v1123_v38 }
 0x238   :  { %1084 = vperm.xlu0 %2468, %v3004_v59   ;;  %1081 = vperm.xlu1 %2469, %v3002_v19  }
 0x239   :  { %v928_v61 = vpop.xlane.xlu1 %927  ;;  %v914_v29 = vpop.xlane.xlu0 %913 }
 0x23a   :  { %v3010_v10 = vadd.f32 %v1003_v48, %v928_v61  ;;  %v3014_v4 = vadd.f32 %v966_v55, %v914_v29 }
 0x23c   :  { %1108 = vperm.xlu0 %2468, %v3010_v10   ;;  %1105 = vperm.xlu1 %2469, %v3008_v62  }
 0x23d   :  { %v916_v40 = vpop.xlane.xlu1 %915  ;;  %v930_v63 = vpop.xlane.xlu0 %929 }
 0x23e   :  { %v3016_v6 = vadd.f32 %v970_v42, %v916_v40  ;;  %v3020_v12 = vadd.f32 %v1010_v27, %v930_v63 }
 0x240   :  { %1090 = vperm.xlu0 %2468, %v3016_v6   ;;  %1087 = vperm.xlu1 %2469, %v3014_v4  }
 0x241   :  { %v932_v21 = vpop.xlane.xlu1 %931  ;;  %v918_v45 = vpop.xlane.xlu0 %917 }
 0x242   :  { %v3022_v31 = vadd.f32 %v1014_v51, %v932_v21  ;;  %v3026_v16 = vadd.f32 %v977_v43, %v918_v45  ;;  %v3040_v43 = vsub.s32 %v1123_v38, %v2878_v1 }
 0x244   :  { %1114 = vperm.xlu0 %2468, %v3022_v31   ;;  %1111 = vperm.xlu1 %2469, %v3020_v12  }
 0x245   :  { %v920_v22 = vpop.xlane.xlu1 %919  ;;  %v934_v14 = vpop.xlane.xlu0 %933 }
 0x246   :  { %v3028_v18 = vadd.f32 %v981_v44, %v920_v22  ;;  %v3043_v44 = vsub.s32 %v1128_v25, %v2878_v1 }
 0x248   :  { %1096 = vperm.xlu0 %2468, %v3028_v18   ;;  %1093 = vperm.xlu1 %2469, %v3026_v16  }
 0x249   :  { %v936_v20 = vpop.xlane.xlu1 %935  ;;  %v1021_v23 = vpop.permute.xlu0 %1020 }
 0x24a   :  { %v3032_v8 = vadd.f32 %v1021_v23, %v934_v14 }
 0x24c   :  { %1117 = vperm.xlu1 %2469, %v3032_v8  }
 0x24d   :  { %v1025_v50 = vpop.permute.xlu1 %1024 }
 0x24e   :  { %v3035_v24 = vadd.f32 %v1025_v50, %v936_v20 }
 0x250   :  { %1120 = vperm.xlu0 %2468, %v3035_v24  }
 0x2ab   :  { %v1076_v26 = vpop.permute.xlu0 %1075 }
 0x2ac   :  { %v1127_v60 = vrot.slane %v1076_v26, %v3040_v43 }
 0x2af   :  { %v1100_v30 = vpop.permute.xlu1 %1099  ;;  %v1103_v32 = vpop.permute.xlu0 %1102 }
 0x2b0   :  { %v1165_v1 = vrot.slane %v1100_v30, %v3040_v43  ;;  %v1169_v17 = vrot.slane %v1103_v32, %v3043_v44 }
 0x2b2   :  { %v1170_v14 = vsel %vm1133_vm0, %v1169_v17, %v1165_v1 }
 0x2b3   :  { %v1079_v33 = vpop.permute.xlu1 %1078 }
 0x2b4   :  { %v1132_v51 = vrot.slane %v1079_v33, %v3043_v44 }
 0x2b6   :  { %v1134_v49 = vsel %vm1133_vm0, %v1132_v51, %v1127_v60 }
 0x2b7   :  { %v1082_v34 = vpop.permute.xlu1 %1081  ;;  %v1085_v37 = vpop.permute.xlu0 %1084 }
 0x2b8   :  { %v1138_v46 = vrot.slane %v1082_v34, %v3040_v43  ;;  %v1142_v28 = vrot.slane %v1085_v37, %v3043_v44 }
 0x2ba   :  { %v1143_v3 = vsel %vm1133_vm0, %v1142_v28, %v1138_v46 }
 0x2bb   :  { %v1106_v39 = vpop.permute.xlu1 %1105  ;;  %v1109_v41 = vpop.permute.xlu0 %1108  ;;  %v1199_v40 = vsel %vm1198_vm1, %v1143_v3, %v1134_v49 }
 0x2bc   :  { %v1174_v63 = vrot.slane %v1106_v39, %v3040_v43  ;;  %v1178_v21 = vrot.slane %v1109_v41, %v3043_v44 }
 0x2be   :  { %v1179_v32 = vsel %vm1133_vm0, %v1178_v21, %v1174_v63 }
 0x2bf   :  { %v1088_v55 = vpop.permute.xlu1 %1087  ;;  %v1091_v42 = vpop.permute.xlu0 %1090 }
 0x2c0   :  { %v1147_v47 = vrot.slane %v1088_v55, %v3040_v43  ;;  %v1151_v48 = vrot.slane %v1091_v42, %v3043_v44 }
 0x2c2   :  { %v1152_v54 = vsel %vm1133_vm0, %v1151_v48, %v1147_v47 }
 0x2c3   :  { %v1112_v0 = vpop.permute.xlu1 %1111  ;;  %v1115_v27 = vpop.permute.xlu0 %1114  ;;  %v1201_v45 = vsel %vm1200_vm2, %v1152_v54, %v1199_v40 }
 0x2c4   :  { %v1183_v50 = vrot.slane %v1112_v0, %v3040_v43  ;;  %v1187_v26 = vrot.slane %v1115_v27, %v3043_v44 }
 0x2c6   :  { %v1188_v39 = vsel %vm1133_vm0, %v1187_v26, %v1183_v50 }
 0x2c7   :  { %v1094_v56 = vpop.permute.xlu1 %1093  ;;  %v1097_v58 = vpop.permute.xlu0 %1096 }
 0x2c8   :  { %v1156_v61 = vrot.slane %v1094_v56, %v3040_v43  ;;  %v1160_v29 = vrot.slane %v1097_v58, %v3043_v44 }
 0x2ca   :  { %v1161_v22 = vsel %vm1133_vm0, %v1160_v29, %v1156_v61 }
 0x2cb   :  { %v1203_v20 = vsel %vm1202_vm3, %v1161_v22, %v1201_v45  ;;  %v1118_v30 = vpop.permute.xlu1 %1117 }
 0x2cc   :  { %v1205_v23 = vsel %vm1204_vm4, %v1170_v14, %v1203_v20  ;;  %v1192_v37 = vrot.slane %v1118_v30, %v3040_v43 }
 0x2cd   :  { %v1207_v34 = vsel %vm1206_vm5, %v1179_v32, %v1205_v23 }
 0x2ce   :  { %v1209_v25 = vsel %vm1208_vm6, %v1188_v39, %v1207_v34 }
 0x2cf   :  { %v1121_v33 = vpop.permute.xlu0 %1120 }
 0x2d0   :  { %v1196_v38 = vrot.slane %v1121_v33, %v3043_v44 }
 0x2d2   :  { %v1197_v41 = vsel %vm1133_vm0, %v1196_v38, %v1192_v37 }
 0x2d3   :  { %v1211_v55 = vsel %vm1210_vm7, %v1197_v41, %v1209_v25 }
 0x2d4   :  { %v1214_v42 = vsel %vm1213_vm8, %v1211_v55, -inf }
 0x2d5   :  { %1215 = vmax.xlane.f32.xlu1 %v1214_v42 }
 0x362   :  { %v1216_v46 = vpop.xlane.xlu1 %1215 }
 0x363   :  { %v1221_v28 = vrot.slane %v1216_v46, %v2881_v2  ;;  %v1225_v48 = vrot.slane %v1216_v46, %v2891_v5  ;;  %v1237_v27 = vrot.slane %v1216_v46, %v2906_v11  ;;  %v3085_v17 = vrot.slane %v1216_v46, %v2986_v36 }
 0x364   :  { %v1229_v54 = vrot.slane %v1216_v46, %v2896_v7  ;;  %v1233_v29 = vrot.slane %v1216_v46, %v2901_v9 }
 0x365   :  { %v1258_v47 = vsub.f32 %v2990_v52, %v1221_v28  ;;  %v1259_v0 = vsub.f32 %v2999_v57, %v1221_v28  ;;  %v1260_v60 = vsub.f32 %v3002_v19, %v1225_v48  ;;  %v1267_v1 = vsub.f32 %v2993_v35, %v1237_v27 }
 0x366   :  { %v1261_v52 = vsub.f32 %v3004_v59, %v1225_v48  ;;  %v1273_v57 = vsub.f32 %v3035_v24, %v3085_v17  ;;  %v1262_v49 = vsub.f32 %v3014_v4, %v1229_v54  ;;  %v1263_v59 = vsub.f32 %v3016_v6, %v1229_v54 }
 0x367   :  { %v1274_v51 = vmul.f32 1.442695, %v1258_v47  ;;  %v1276_v3 = vmul.f32 1.442695, %v1259_v0  ;;  %v1278_v56 = vmul.f32 1.442695, %v1260_v60  ;;  %v1264_v4 = vsub.f32 %v3026_v16, %v1233_v29 }
 0x368   :  { %v1292_v58 = vmul.f32 1.442695, %v1267_v1  ;;  %v1280_v19 = vmul.f32 1.442695, %v1261_v52  ;;  %v1304_v35 = vmul.f32 1.442695, %v1273_v57  ;;  %v1265_v22 = vsub.f32 %v3028_v18, %v1233_v29 }
 0x369   :  { %2575 = vpow2.f32 %v1274_v51  ;;  %v1282_v40 = vmul.f32 1.442695, %v1262_v49  ;;  %v1284_v24 = vmul.f32 1.442695, %v1263_v59  ;;  %v1286_v6 = vmul.f32 1.442695, %v1264_v4 }
 0x36a   :  { %2577 = vpow2.f32 %v1276_v3  ;;  %v1241_v16 = vrot.slane %v1216_v46, %v2911_v13  ;;  %v1266_v20 = vsub.f32 %v2995_v53, %v1237_v27  ;;  %v1288_v23 = vmul.f32 1.442695, %v1265_v22 }
 0x36b   :  { %2579 = vpow2.f32 %v1278_v56  ;;  %v1245_v53 = vrot.slane %v1216_v46, %v2916_v15 }
 0x36c   :  { %2581 = vpow2.f32 %v1292_v58  ;;  %v1268_v18 = vsub.f32 %v3008_v62, %v1241_v16  ;;  %v1290_v30 = vmul.f32 1.442695, %v1266_v20  ;;  %v1269_v33 = vsub.f32 %v3010_v10, %v1241_v16 }
 0x36d   :  { %2583 = vpow2.f32 %v1280_v19  ;;  %v1270_v38 = vsub.f32 %v3020_v12, %v1245_v53  ;;  %v1271_v41 = vsub.f32 %v3022_v31, %v1245_v53  ;;  %v1272_v10 = vsub.f32 %v3032_v8, %v3085_v17 }
 0x36e   :  { %2585 = vpow2.f32 %v1304_v35  ;;  %v1294_v34 = vmul.f32 1.442695, %v1268_v18  ;;  %v1296_v62 = vmul.f32 1.442695, %v1269_v33 }
 0x36f   :  { %2587 = vpow2.f32 %v1282_v40  ;;  %v1298_v25 = vmul.f32 1.442695, %v1270_v38  ;;  %v1300_v42 = vmul.f32 1.442695, %v1271_v41  ;;  %v1302_v46 = vmul.f32 1.442695, %v1272_v10 }
 0x370   :  { %2589 = vpow2.f32 %v1284_v24 }
 0x371   :  { %2591 = vpow2.f32 %v1286_v6 }
 0x372   :  { %2593 = vpow2.f32 %v1288_v23 }
 0x373   :  { %v3092_v61 = vpop.eup %2575  ;;  %2595 = vpow2.f32 %v1290_v30 }
 0x374   :  { %1323 = vperm.xlu0 %2468, %v3092_v61   ;;  %v3097_v63 = vpop.eup %2577  ;;  %2597 = vpow2.f32 %v1294_v34 }
 0x375   :  { %v3101_v21 = vpop.eup %2579  ;;  %2599 = vpow2.f32 %v1296_v62 }
 0x376   :  { %v3103_v45 = vpop.eup %2581  ;;  %2601 = vpow2.f32 %v1298_v25 }
 0x377   :  { %1350 = vperm.xlu1 %2469, %v3103_v45   ;;  %v3108_v14 = vpop.eup %2583  ;;  %2603 = vpow2.f32 %v1300_v42 }
 0x378   :  { %1326 = vperm.xlu0 %2468, %v3097_v63   ;;  %v3113_v50 = vpop.eup %2585  ;;  %2605 = vpow2.f32 %v1302_v46 }
 0x379   :  { %v3115_v26 = vpop.eup %2587 }
 0x37a   :  { %v3120_v32 = vpop.eup %2589 }
 0x37b   :  { %1368 = vperm.xlu1 %2469, %v3113_v50   ;;  %v3125_v37 = vpop.eup %2591 }
 0x37c   :  { %1329 = vperm.xlu0 %2468, %v3101_v21   ;;  %v3129_v39 = vpop.eup %2593 }
 0x37d   :  { %v3133_v55 = vpop.eup %2595 }
 0x37e   :  { %v3138_v12 = vpop.eup %2597 }
 0x37f   :  { %v3141_v28 = vpop.eup %2599 }
 0x380   :  { %1332 = vperm.xlu0 %2468, %v3108_v14   ;;  %v3144_v31 = vpop.eup %2601 }
 0x381   :  { %v3147_v47 = vpop.eup %2603 }
 0x382   :  { %v3150_v8 = vpop.eup %2605 }
 0x384   :  { %1335 = vperm.xlu0 %2468, %v3115_v26  }
 0x388   :  { %1338 = vperm.xlu0 %2468, %v3120_v32  }
 0x38c   :  { %1341 = vperm.xlu0 %2468, %v3125_v37  }
 0x390   :  { %1344 = vperm.xlu0 %2468, %v3129_v39  }
 0x394   :  { %1347 = vperm.xlu0 %2468, %v3133_v55  }
 0x398   :  { %1353 = vperm.xlu0 %2468, %v3138_v12  }
 0x39c   :  { %1356 = vperm.xlu0 %2468, %v3141_v28  }
 0x3a0   :  { %1359 = vperm.xlu0 %2468, %v3144_v31  }
 0x3a4   :  { %1362 = vperm.xlu0 %2468, %v3147_v47  }
 0x3a8   :  { %1365 = vperm.xlu0 %2468, %v3150_v8  }
 0x3f3   :  { %v1324_v48 = vpop.permute.xlu0 %1323 }
 0x3f4   :  { %v1373_v24 = vrot.slane %v1324_v48, %v3040_v43 }
 0x3f6   :  { %v1351_v57 = vpop.permute.xlu1 %1350 }
 0x3f7   :  { %v1327_v0 = vpop.permute.xlu0 %1326  ;;  %v1413_v20 = vrot.slane %v1351_v57, %v3043_v44 }
 0x3f8   :  { %v1377_v35 = vrot.slane %v1327_v0, %v3043_v44 }
 0x3fa   :  { %v1378_v30 = vsel %vm1133_vm0, %v1377_v35, %v1373_v24  ;;  %v1369_v38 = vpop.permute.xlu1 %1368 }
 0x3fb   :  { %v1330_v27 = vpop.permute.xlu0 %1329 }
 0x3fc   :  { %v1382_v29 = vrot.slane %v1330_v27, %v3040_v43  ;;  %v1440_v27 = vrot.slane %v1369_v38, %v3043_v44 }
 0x3ff   :  { %v1333_v51 = vpop.permute.xlu0 %1332 }
 0x400   :  { %v1386_v58 = vrot.slane %v1333_v51, %v3043_v44 }
 0x402   :  { %v1387_v22 = vsel %vm1133_vm0, %v1386_v58, %v1382_v29 }
 0x403   :  { %v1336_v60 = vpop.permute.xlu0 %1335  ;;  %v1442_v62 = vsel %vm1198_vm1, %v1387_v22, %v1378_v30  ;;  %v2612_v22 = vld [vmem:[#allocation7 + $0x198] sm:$0xff] }
 0x404   :  { %v1391_v40 = vrot.slane %v1336_v60, %v3040_v43 }
 0x407   :  { %v1339_v3 = vpop.permute.xlu0 %1338 }
 0x408   :  { %v1395_v49 = vrot.slane %v1339_v3, %v3043_v44 }
 0x40a   :  { %v1396_v23 = vsel %vm1133_vm0, %v1395_v49, %v1391_v40  ;;  %v2609_v40 = vld [vmem:[#allocation7 + $0x180] sm:$0xff] }
 0x40b   :  { %v1342_v1 = vpop.permute.xlu0 %1341  ;;  %v1443_v10 = vsel %vm1200_vm2, %v1396_v23, %v1442_v62  ;;  %v2618_v62 = vld [vmem:[#allocation7 + $0x18] sm:$0xff] }
 0x40c   :  { %v1400_v6 = vrot.slane %v1342_v1, %v3040_v43 }
 0x40f   :  { %v1345_v17 = vpop.permute.xlu0 %1344 }
 0x410   :  { %v1404_v59 = vrot.slane %v1345_v17, %v3043_v44 }
 0x412   :  { %v1405_v53 = vsel %vm1133_vm0, %v1404_v59, %v1400_v6  ;;  %v2613_v6 = vld [vmem:[#allocation7 + $0x1a0] sm:$0xff] }
 0x413   :  { %v1348_v54 = vpop.permute.xlu0 %1347  ;;  %v1444_v46 = vsel %vm1202_vm3, %v1405_v53, %v1443_v10 }
 0x414   :  { %v1409_v4 = vrot.slane %v1348_v54, %v3040_v43 }
 0x416   :  { %v1414_v41 = vsel %vm1133_vm0, %v1413_v20, %v1409_v4  ;;  %v2615_v20 = vld [vmem:[#allocation7] sm:$0xff] }
 0x417   :  { %v1354_v52 = vpop.permute.xlu0 %1353  ;;  %v1445_v51 = vsel %vm1204_vm4, %v1414_v41, %v1444_v46 }
 0x418   :  { %v1418_v33 = vrot.slane %v1354_v52, %v3040_v43 }
 0x41b   :  { %v1357_v56 = vpop.permute.xlu0 %1356 }
 0x41c   :  { %v1422_v16 = vrot.slane %v1357_v56, %v3043_v44 }
 0x41e   :  { %v1423_v42 = vsel %vm1133_vm0, %v1422_v16, %v1418_v33  ;;  %v2614_v16 = vld [vmem:[#allocation7 + $0x1a8] sm:$0xff] }
 0x41f   :  { %v1360_v19 = vpop.permute.xlu0 %1359  ;;  %v1446_v3 = vsel %vm1206_vm5, %v1423_v42, %v1445_v51  ;;  %v2620_v42 = vld [vmem:[#allocation7 + $0x28] sm:$0xff] }
 0x420   :  { %v1427_v25 = vrot.slane %v1360_v19, %v3040_v43 }
 0x423   :  { %v1363_v18 = vpop.permute.xlu0 %1362 }
 0x424   :  { %v1431_v34 = vrot.slane %v1363_v18, %v3043_v44  ;;  %v2616_v18 = vld [vmem:[#allocation7 + $0x8] sm:$0xff] }
 0x426   :  { %v1432_v48 = vsel %vm1133_vm0, %v1431_v34, %v1427_v25  ;;  %v2617_v34 = vld [vmem:[#allocation7 + $0x10] sm:$0xff]  ;;  %v2619_v25 = vld [vmem:[#allocation7 + $0x20] sm:$0xff] }
 0x427   :  { %v1366_v0 = vpop.permute.xlu0 %1365  ;;  %v1447_v17 = vsel %vm1208_vm6, %v1432_v48, %v1446_v3  ;;  %v2621_v48 = vld [vmem:[#allocation7 + $0x2d0] sm:$0xff] }
 0x428   :  { %v1436_v60 = vrot.slane %v1366_v0, %v3040_v43 }
 0x42a   :  { %v1441_v1 = vsel %vm1133_vm0, %v1440_v27, %v1436_v60  ;;  %v2622_v27 = vld [vmem:[#allocation7 + $0x2d8] sm:$0xff]  ;;  %v2623_v60 = vld [vmem:[#allocation7 + $0x30] sm:$0xff] }
 0x42b   :  { %v1448_v54 = vsel %vm1210_vm7, %v1441_v1, %v1447_v17  ;;  %v2624_v1 = vld [vmem:[#allocation7 + $0x38] sm:$0xff] }
 0x42c   :  { %v1450_v52 = vsel %vm1213_vm8, %v1448_v54, 0.0  ;;  %v2625_v54 = vld [vmem:[#allocation7 + $0x40] sm:$0xff] }
 0x42d   :  { %1451 = vadd.xlane.f32.xlu0 %v1450_v52 }
 0x4ba   :  { %v1452_v56 = vpop.xlane.xlu0 %1451 }
 0x4bb   :  { %2607 = vrcp.f32 %v1452_v56  ;;  %v2626_v56 = vld [vmem:[#allocation7 + $0x48] sm:$0xff] }
 0x4c5   :  { %v2608_v58 = vpop.eup %2607 }
 0x4c6   :  { %v1474_v44 = vrot.slane %v2608_v58, %v2906_v11  ;;  %v1458_v57 = vrot.slane %v2608_v58, %v2881_v2  ;;  %v1486_v19 = vrot.slane %v2608_v58, %v2986_v36  ;;  %v1462_v59 = vrot.slane %v2608_v58, %v2891_v5 }
 0x4c8   :  { %v1503_v43 = vmul.f32 %v3133_v55, %v1474_v44  ;;  %v1495_v49 = vmul.f32 %v3092_v61, %v1458_v57  ;;  %v1510_v35 = vmul.f32 %v3113_v50, %v1486_v19  ;;  %v1496_v29 = vmul.f32 %v3097_v63, %v1458_v57 }
 0x4c9   :  { %v1497_v11 = vmul.f32 %v3101_v21, %v1462_v59  ;;  %v1498_v2 = vmul.f32 %v3108_v14, %v1462_v59  ;;  %v1466_v55 = vrot.slane %v2608_v58, %v2896_v7  ;;  %v1470_v50 = vrot.slane %v2608_v58, %v2901_v9 }
 0x4ca   :  { %1553 = vperm.xlu0 %2468, %v1503_v43   ;;  %1513 = vperm.xlu1 %2469, %v1495_v49   ;;  %v1504_v21 = vmul.f32 %v3103_v45, %v1474_v44  ;;  %v1478_v14 = vrot.slane %v2608_v58, %v2911_v13  ;;  %v2627_v44 = vld [vmem:[#allocation7 + $0x50] sm:$0xff]  ;;  %v2628_v43 = vld [vmem:[#allocation7 + $0x58] sm:$0xff] }
 0x4cb   :  { %v1499_v36 = vmul.f32 %v3115_v26, %v1466_v55  ;;  %v1500_v61 = vmul.f32 %v3120_v32, %v1466_v55  ;;  %v1501_v5 = vmul.f32 %v3125_v37, %v1470_v50  ;;  %v1502_v63 = vmul.f32 %v3129_v39, %v1470_v50 }
 0x4cc   :  { %v1505_v7 = vmul.f32 %v3138_v12, %v1478_v14  ;;  %v1506_v26 = vmul.f32 %v3141_v28, %v1478_v14  ;;  %v1482_v32 = vrot.slane %v2608_v58, %v2916_v15  ;;  %v1509_v39 = vmul.f32 %v3150_v8, %v1486_v19  ;;  %v2610_v12 = vld [vmem:[#allocation7 + $0x188] sm:$0xff]  ;;  %v2611_v28 = vld [vmem:[#allocation7 + $0x190] sm:$0xff]  ;;  %v2629_v19 = vld [vmem:[#allocation7 + $0x2e0] sm:$0xff] }
 0x4ce   :  { %1588 = vperm.xlu0 %2468, %v1510_v35   ;;  %1518 = vperm.xlu1 %2469, %v1496_v29   ;;  %v1507_v9 = vmul.f32 %v3144_v31, %v1482_v32  ;;  %v1508_v37 = vmul.f32 %v3147_v47, %v1482_v32  ;;  %v2630_v29 = vld [vmem:[#allocation7 + $0x2e8] sm:$0xff] }
 0x4d2   :  { %1523 = vperm.xlu1 %2469, %v1497_v11  }
 0x4d6   :  { %1528 = vperm.xlu1 %2469, %v1498_v2  }
 0x4da   :  { %1533 = vperm.xlu1 %2469, %v1499_v36  }
 0x4de   :  { %1538 = vperm.xlu1 %2469, %v1500_v61  }
 0x4e2   :  { %1543 = vperm.xlu1 %2469, %v1501_v5  }
 0x4e6   :  { %1548 = vperm.xlu1 %2469, %v1502_v63   ;;  %v2631_v63 = vld [vmem:[#allocation7 + $0x2f0] sm:$0xff] }
 0x4ea   :  { %1558 = vperm.xlu1 %2469, %v1504_v21  }
 0x4ee   :  { %1563 = vperm.xlu1 %2469, %v1505_v7  }
 0x4f2   :  { %1568 = vperm.xlu1 %2469, %v1506_v26   ;;  %v2632_v26 = vld [vmem:[#allocation7 + $0x60] sm:$0xff] }
 0x4f6   :  { %1573 = vperm.xlu1 %2469, %v1507_v9  }
 0x4fa   :  { %1578 = vperm.xlu1 %2469, %v1508_v37  }
 0x4fe   :  { %1583 = vperm.xlu1 %2469, %v1509_v39  }
 0x549   :  { %v1554_v45 = vpop.permute.xlu0 %1553  ;;  %v1514_v13 = vpop.permute.xlu1 %1513 }
 0x54a   :  { %v3209_v4 = vmul.f32 %v2609_v40, %v1554_v45  ;;  %v3211_v24 = vmul.f32 %v2610_v12, %v1554_v45  ;;  %v3213_v15 = vmul.f32 %v2611_v28, %v1554_v45  ;;  %v3215_v31 = vmul.f32 %v2612_v22, %v1554_v45  ;;  %v2633_v12 = vld [vmem:[#allocation7 + $0x68] sm:$0xff]  ;;  %v2634_v22 = vld [vmem:[#allocation7 + $0x70] sm:$0xff] }
 0x54b   :  { %v3217_v47 = vmul.f32 %v2613_v6, %v1554_v45  ;;  %v3219_v8 = vmul.f32 %v2614_v16, %v1554_v45  ;;  %v1591_v23 = vmul.f32 %v2615_v20, %v1514_v13  ;;  %v1592_v30 = vmul.f32 %v2616_v18, %v1514_v13 }
 0x54c   :  { %v1593_v38 = vmul.f32 %v2617_v34, %v1514_v13  ;;  %v1594_v41 = vmul.f32 %v2618_v62, %v1514_v13  ;;  %v1595_v10 = vmul.f32 %v2619_v25, %v1514_v13  ;;  %v1596_v46 = vmul.f32 %v2620_v42, %v1514_v13 }
 0x54d   :  { %v3221_v53 = vpop.permute.xlu0 %1588  ;;  %v1519_v33 = vpop.permute.xlu1 %1518 }
 0x54e   :  { %v3224_v0 = vmul.f32 %v2621_v48, %v3221_v53  ;;  %v3227_v51 = vmul.f32 %v2622_v27, %v3221_v53  ;;  %v1597_v3 = vmul.f32 %v2623_v60, %v1519_v33  ;;  %v1598_v17 = vmul.f32 %v2624_v1, %v1519_v33 }
 0x54f   :  { %v1599_v52 = vmul.f32 %v2625_v54, %v1519_v33  ;;  %v1600_v58 = vmul.f32 %v2626_v56, %v1519_v33  ;;  %v1601_v57 = vmul.f32 %v2627_v44, %v1519_v33  ;;  %v1602_v49 = vmul.f32 %v2628_v43, %v1519_v33 }
 0x550   :  { %v3230_v35 = vmul.f32 %v2629_v19, %v3221_v53  ;;  %v3233_v59 = vmul.f32 %v2630_v29, %v3221_v53  ;;  %v1687_v11 = vadd.f32 %v1597_v3, %v1591_v23  ;;  %v1694_v2 = vadd.f32 %v1598_v17, %v1592_v30  ;;  %v2637_v3 = vld [vmem:[#allocation7 + $0x90] sm:$0xff]  ;;  %v2638_v17 = vld [vmem:[#allocation7 + $0x98] sm:$0xff]  ;;  %v2640_v29 = vld [vmem:[#allocation7 + $0xa8] sm:$0xff] }
 0x551   :  { %v3235_v55 = vpop.permute.xlu1 %1523  ;;  %v1701_v36 = vadd.f32 %v1599_v52, %v1593_v38  ;;  %v1708_v61 = vadd.f32 %v1600_v58, %v1594_v41  ;;  %v1715_v50 = vadd.f32 %v1601_v57, %v1595_v10  ;;  %v1722_v5 = vadd.f32 %v1602_v49, %v1596_v46  ;;  %v2635_v38 = vld [vmem:[#allocation7 + $0x78] sm:$0xff]  ;;  %v2636_v41 = vld [vmem:[#allocation7 + $0x80] sm:$0xff] }
 0x552   :  { %v3238_v21 = vmul.f32 %v2631_v63, %v3221_v53  ;;  %v1688_v14 = vrot.slane %v1687_v11, 4  ;;  %v1695_v7 = vrot.slane %v1694_v2, 4  ;;  %v1603_v32 = vmul.f32 %v2632_v26, %v3235_v55  ;;  %v2639_v49 = vld [vmem:[#allocation7 + $0xa0] sm:$0xff]  ;;  %v2642_v26 = vld [vmem:[#allocation7 + $0xb8] sm:$0xff] }
 0x553   :  { %v1702_v9 = vrot.slane %v1701_v36, 4  ;;  %v1709_v37 = vrot.slane %v1708_v61, 4  ;;  %v1716_v39 = vrot.slane %v1715_v50, 4  ;;  %v1723_v45 = vrot.slane %v1722_v5, 4 }
 0x554   :  { %v1689_v13 = vadd.f32 %v1688_v14, %v1687_v11  ;;  %v1696_v40 = vadd.f32 %v1695_v7, %v1694_v2  ;;  %v1604_v28 = vmul.f32 %v2633_v12, %v3235_v55  ;;  %v1605_v6 = vmul.f32 %v2634_v22, %v3235_v55  ;;  %v2641_v14 = vld [vmem:[#allocation7 + $0xb0] sm:$0xff] }
 0x555   :  { %v1703_v16 = vadd.f32 %v1702_v9, %v1701_v36  ;;  %v1710_v20 = vadd.f32 %v1709_v37, %v1708_v61  ;;  %v1717_v23 = vadd.f32 %v1716_v39, %v1715_v50  ;;  %v1724_v18 = vadd.f32 %v1723_v45, %v1722_v5  ;;  %v1529_v30 = vpop.permute.xlu1 %1528 }
 0x556   :  { %v1690_v33 = vrot.slane %v1689_v13, 2  ;;  %v1697_v34 = vrot.slane %v1696_v40, 2  ;;  %v1606_v62 = vmul.f32 %v2635_v38, %v3235_v55  ;;  %v1607_v25 = vmul.f32 %v2636_v41, %v3235_v55 }
 0x557   :  { %v1704_v10 = vrot.slane %v1703_v16, 2  ;;  %v1711_v42 = vrot.slane %v1710_v20, 2  ;;  %v1718_v46 = vrot.slane %v1717_v23, 2  ;;  %v1725_v48 = vrot.slane %v1724_v18, 2 }
 0x558   :  { %v1691_v27 = vadd.f32 %v1690_v33, %v1689_v13  ;;  %v1698_v60 = vadd.f32 %v1697_v34, %v1696_v40  ;;  %v1609_v1 = vmul.f32 %v2637_v3, %v1529_v30  ;;  %v1610_v54 = vmul.f32 %v2638_v17, %v1529_v30  ;;  %v2643_v34 = vld [vmem:[#allocation7 + $0x2f8] sm:$0xff] }
 0x559   :  { %v1705_v52 = vadd.f32 %v1704_v10, %v1703_v16  ;;  %v1712_v56 = vadd.f32 %v1711_v42, %v1710_v20  ;;  %v1719_v58 = vadd.f32 %v1718_v46, %v1717_v23  ;;  %v1726_v44 = vadd.f32 %v1725_v48, %v1724_v18  ;;  %v3255_v46 = vpop.permute.xlu1 %1533 }
 0x55a   :  { %v1692_v57 = vrot.slane %v1691_v27, 1  ;;  %v1699_v43 = vrot.slane %v1698_v60, 1  ;;  %v1611_v19 = vmul.f32 %v2639_v49, %v1529_v30  ;;  %v1612_v11 = vmul.f32 %v2640_v29, %v1529_v30  ;;  %v2646_v49 = vld [vmem:[#allocation7 + $0xc8] sm:$0xff] }
 0x55b   :  { %v1706_v2 = vrot.slane %v1705_v52, 1  ;;  %v1713_v36 = vrot.slane %v1712_v56, 1  ;;  %v1720_v61 = vrot.slane %v1719_v58, 1  ;;  %v1727_v50 = vrot.slane %v1726_v44, 1 }
 0x55c   :  { %v1693_v5 = vadd.f32 %v1692_v57, %v1691_v27  ;;  %v1700_v63 = vadd.f32 %v1699_v43, %v1698_v60  ;;  %v1613_v7 = vmul.f32 %v2641_v14, %v1529_v30  ;;  %v1614_v9 = vmul.f32 %v2642_v26, %v1529_v30  ;;  %v2644_v30 = vld [vmem:[#allocation7 + $0x88] sm:$0xff]  ;;  %v2645_v57 = vld [vmem:[#allocation7 + $0xc0] sm:$0xff] }
 0x55d   :  { %v1707_v37 = vadd.f32 %v1706_v2, %v1705_v52  ;;  %v1714_v39 = vadd.f32 %v1713_v36, %v1712_v56  ;;  %v1721_v45 = vadd.f32 %v1720_v61, %v1719_v58  ;;  %v1728_v13 = vadd.f32 %v1727_v50, %v1726_v44  ;;  %v1539_v61 = vpop.permute.xlu1 %1538 }
 0x55e   :  { %v3245_v40 = vpack.c.bf16 %v1700_v63, %v1693_v5  ;;  %v1729_v12 = vadd.f32 %v1609_v1, %v1603_v32  ;;  %v1736_v22 = vadd.f32 %v1610_v54, %v1604_v28  ;;  %v1743_v16 = vadd.f32 %v1611_v19, %v1605_v6  ;;  %v2647_v63 = vld [vmem:[#allocation7 + $0xd0] sm:$0xff] }
 0x55f   :  { %v3247_v20 = vpack.c.bf16 %v1714_v39, %v1707_v37  ;;  %v3249_v23 = vpack.c.bf16 %v1728_v13, %v1721_v45  ;;  %v1750_v18 = vadd.f32 %v1612_v11, %v1606_v62  ;;  %v1757_v33 = vadd.f32 %v1613_v7, %v1607_v25  ;;  %v2648_v7 = vld [vmem:[#allocation7 + $0xd8] sm:$0xff] }
 0x560   :  { %v3252_v38 = vmul.f32 %v2643_v34, %v3221_v53  ;;  %v1608_v41 = vmul.f32 %v2644_v30, %v3235_v55  ;;  %v1730_v10 = vrot.slane %v1729_v12, 4  ;;  %v1737_v42 = vrot.slane %v1736_v22, 4 }
 0x561   :  { %v1744_v27 = vrot.slane %v1743_v16, 4  ;;  %v1751_v53 = vrot.slane %v1750_v18, 4  ;;  %v1758_v3 = vrot.slane %v1757_v33, 4  ;;  %v1615_v43 = vmul.f32 %v2645_v57, %v3255_v46  ;;  %v2654_v57 = vld [vmem:[#allocation7 + $0xe0] sm:$0xff] }
 0x562   :  { %v1731_v25 = vadd.f32 %v1730_v10, %v1729_v12  ;;  %v1738_v48 = vadd.f32 %v1737_v42, %v1736_v22  ;;  %v1764_v1 = vadd.f32 %v1614_v9, %v1608_v41  ;;  %v1616_v19 = vmul.f32 %v2646_v49, %v3255_v46  ;;  %v2649_v22 = vld [vmem:[#allocation7 + $0xf0] sm:$0xff] }
 0x563   :  { %v1745_v52 = vadd.f32 %v1744_v27, %v1743_v16  ;;  %v1752_v56 = vadd.f32 %v1751_v53, %v1750_v18  ;;  %v1759_v58 = vadd.f32 %v1758_v3, %v1757_v33  ;;  %v1617_v14 = vmul.f32 %v2647_v63, %v3255_v46  ;;  %v2650_v18 = vld [vmem:[#allocation7 + $0xf8] sm:$0xff]  ;;  %v2652_v53 = vld [vmem:[#allocation7 + $0x108] sm:$0xff] }
 0x564   :  { %v1732_v17 = vrot.slane %v1731_v25, 2  ;;  %v1739_v54 = vrot.slane %v1738_v48, 2  ;;  %v1765_v44 = vrot.slane %v1764_v1, 4  ;;  %v1618_v26 = vmul.f32 %v2648_v7, %v3255_v46 }
 0x565   :  { %v1746_v2 = vrot.slane %v1745_v52, 2  ;;  %v1753_v36 = vrot.slane %v1752_v56, 2  ;;  %v1760_v50 = vrot.slane %v1759_v58, 2  ;;  %v1621_v16 = vmul.f32 %v2649_v22, %v1539_v61 }
 0x566   :  { %v1733_v29 = vadd.f32 %v1732_v17, %v1731_v25  ;;  %v1740_v11 = vadd.f32 %v1739_v54, %v1738_v48  ;;  %v1766_v5 = vadd.f32 %v1765_v44, %v1764_v1  ;;  %v1622_v33 = vmul.f32 %v2650_v18, %v1539_v61  ;;  %v2651_v48 = vld [vmem:[#allocation7 + $0x100] sm:$0xff]  ;;  %v3275_v18 = vpop.permute.xlu1 %1543 }
 0x567   :  { %v1747_v39 = vadd.f32 %v1746_v2, %v1745_v52  ;;  %v1754_v45 = vadd.f32 %v1753_v36, %v1752_v56  ;;  %v1761_v13 = vadd.f32 %v1760_v50, %v1759_v58  ;;  %v1623_v27 = vmul.f32 %v2651_v48, %v1539_v61  ;;  %v2653_v52 = vld [vmem:[#allocation7 + $0x110] sm:$0xff]  ;;  %v2655_v2 = vld [vmem:[#allocation7 + $0xe8] sm:$0xff]  ;;  %v2656_v50 = vld [vmem:[#allocation7 + $0x118] sm:$0xff] }
 0x568   :  { %v1734_v9 = vrot.slane %v1733_v29, 1  ;;  %v1741_v37 = vrot.slane %v1740_v11, 1  ;;  %v1767_v12 = vrot.slane %v1766_v5, 2  ;;  %v1624_v3 = vmul.f32 %v2652_v53, %v1539_v61 }
 0x569   :  { %v1748_v41 = vrot.slane %v1747_v39, 1  ;;  %v1755_v10 = vrot.slane %v1754_v45, 1  ;;  %v1762_v42 = vrot.slane %v1761_v13, 1  ;;  %v1625_v56 = vmul.f32 %v2653_v52, %v1539_v61 }
 0x56a   :  { %v1735_v34 = vadd.f32 %v1734_v9, %v1733_v29  ;;  %v1742_v30 = vadd.f32 %v1741_v37, %v1740_v11  ;;  %v1768_v25 = vadd.f32 %v1767_v12, %v1766_v5  ;;  %v1619_v49 = vmul.f32 %v2654_v57, %v3255_v46 }
 0x56b   :  { %v1749_v1 = vadd.f32 %v1748_v41, %v1747_v39  ;;  %v1756_v17 = vadd.f32 %v1755_v10, %v1754_v45  ;;  %v1763_v58 = vadd.f32 %v1762_v42, %v1761_v13  ;;  %v1771_v29 = vadd.f32 %v1621_v16, %v1615_v43  ;;  %v2657_v10 = vld [vmem:[#allocation7 + $0x120] sm:$0xff] }
 0x56c   :  { %v3267_v54 = vpack.c.bf16 %v1742_v30, %v1735_v34  ;;  %v1769_v44 = vrot.slane %v1768_v25, 1  ;;  %v1620_v36 = vmul.f32 %v2655_v2, %v3255_v46  ;;  %v1626_v5 = vmul.f32 %v2656_v50, %v1539_v61 }
 0x56d   :  { %v3270_v11 = vpack.c.bf16 %v1756_v17, %v1749_v1  ;;  %v1778_v63 = vadd.f32 %v1622_v33, %v1616_v19  ;;  %v1772_v9 = vrot.slane %v1771_v29, 4  ;;  %v1785_v37 = vadd.f32 %v1623_v27, %v1617_v14 }
 0x56e   :  { %v1770_v7 = vadd.f32 %v1769_v44, %v1768_v25  ;;  %v1792_v39 = vadd.f32 %v1624_v3, %v1618_v26  ;;  %v1799_v22 = vadd.f32 %v1625_v56, %v1619_v49  ;;  %v1806_v30 = vadd.f32 %v1626_v5, %v1620_v36  ;;  %v1549_v49 = vpop.permute.xlu1 %1548  ;;  %v2658_v36 = vld [vmem:[#allocation7 + $0x128] sm:$0xff]  ;;  %v2659_v5 = vld [vmem:[#allocation7 + $0x130] sm:$0xff]  ;;  %v2671_v3 = vld [vmem:[#allocation7 + $0x1c0] sm:$0xff] }
 0x56f   :  { %v1779_v12 = vrot.slane %v1778_v63, 4  ;;  %v1773_v16 = vadd.f32 %v1772_v9, %v1771_v29  ;;  %v1786_v34 = vrot.slane %v1785_v37, 4  ;;  %v1627_v42 = vmul.f32 %v2657_v10, %v3275_v18 }
 0x570   :  { %v3277_v43 = vpack.c.bf16 %v1770_v7, %v1763_v58  ;;  %v1793_v46 = vrot.slane %v1792_v39, 4  ;;  %v1800_v33 = vrot.slane %v1799_v22, 4  ;;  %v1807_v53 = vrot.slane %v1806_v30, 4 }
 0x571   :  { %v1780_v19 = vadd.f32 %v1779_v12, %v1778_v63  ;;  %v1774_v26 = vrot.slane %v1773_v16, 2  ;;  %v1787_v41 = vadd.f32 %v1786_v34, %v1785_v37  ;;  %v1628_v50 = vmul.f32 %v2658_v36, %v3275_v18 }
 0x572   :  { %v1794_v48 = vadd.f32 %v1793_v46, %v1792_v39  ;;  %v1801_v27 = vadd.f32 %v1800_v33, %v1799_v22  ;;  %v1808_v57 = vadd.f32 %v1807_v53, %v1806_v30  ;;  %v1629_v63 = vmul.f32 %v2659_v5, %v3275_v18  ;;  %v2661_v46 = vld [vmem:[#allocation7 + $0x150] sm:$0xff]  ;;  %v2664_v5 = vld [vmem:[#allocation7 + $0x168] sm:$0xff] }
 0x573   :  { %v1781_v25 = vrot.slane %v1780_v19, 2  ;;  %v1775_v17 = vadd.f32 %v1774_v26, %v1773_v16  ;;  %v1788_v52 = vrot.slane %v1787_v41, 2  ;;  %v2660_v16 = vld [vmem:[#allocation7 + $0x138] sm:$0xff] }
 0x574   :  { %v1795_v58 = vrot.slane %v1794_v48, 2  ;;  %v1802_v44 = vrot.slane %v1801_v27, 2  ;;  %v1809_v39 = vrot.slane %v1808_v57, 2  ;;  %v1630_v34 = vmul.f32 %v2660_v16, %v3275_v18 }
 0x575   :  { %v1782_v56 = vadd.f32 %v1781_v25, %v1780_v19  ;;  %v1776_v29 = vrot.slane %v1775_v17, 1  ;;  %v1789_v2 = vadd.f32 %v1788_v52, %v1787_v41  ;;  %v1633_v19 = vmul.f32 %v2661_v46, %v1549_v49  ;;  %v2662_v25 = vld [vmem:[#allocation7 + $0x158] sm:$0xff]  ;;  %v2663_v52 = vld [vmem:[#allocation7 + $0x160] sm:$0xff]  ;;  %v2666_v46 = vld [vmem:[#allocation7 + $0x170] sm:$0xff] }
 0x576   :  { %v1796_v9 = vadd.f32 %v1795_v58, %v1794_v48  ;;  %v1803_v37 = vadd.f32 %v1802_v44, %v1801_v27  ;;  %v1810_v41 = vadd.f32 %v1809_v39, %v1808_v57  ;;  %v1634_v53 = vmul.f32 %v2662_v25, %v1549_v49  ;;  %v2667_v39 = vld [vmem:[#allocation7 + $0x148] sm:$0xff]  ;;  %v2668_v25 = vld [vmem:[#allocation7 + $0x178] sm:$0xff] }
 0x577   :  { %v1783_v7 = vrot.slane %v1782_v56, 1  ;;  %v1777_v12 = vadd.f32 %v1776_v29, %v1775_v17  ;;  %v1790_v22 = vrot.slane %v1789_v2, 1  ;;  %v1635_v36 = vmul.f32 %v2663_v52, %v1549_v49  ;;  %v2665_v29 = vld [vmem:[#allocation7 + $0x140] sm:$0xff] }
 0x578   :  { %v1797_v30 = vrot.slane %v1796_v9, 1  ;;  %v1804_v26 = vrot.slane %v1803_v37, 1  ;;  %v1636_v48 = vmul.f32 %v2664_v5, %v1549_v49  ;;  %v1811_v17 = vrot.slane %v1810_v41, 1  ;;  %v2694_v5 = vld [vmem:[#allocation7 + $0x268] sm:$0xff] }
 0x579   :  { %v1784_v33 = vadd.f32 %v1783_v7, %v1782_v56  ;;  %v1791_v10 = vadd.f32 %v1790_v22, %v1789_v2  ;;  %v1631_v16 = vmul.f32 %v2665_v29, %v3275_v18  ;;  %v1637_v56 = vmul.f32 %v2666_v46, %v1549_v49 }
 0x57a   :  { %v1798_v27 = vadd.f32 %v1797_v30, %v1796_v9  ;;  %v1805_v58 = vadd.f32 %v1804_v26, %v1803_v37  ;;  %v1813_v7 = vadd.f32 %v1633_v19, %v1627_v42  ;;  %v1820_v1 = vadd.f32 %v1634_v53, %v1628_v50  ;;  %v1559_v53 = vpop.permute.xlu1 %1558  ;;  %v2700_v26 = vld [vmem:[#allocation7 + $0x2a8] sm:$0xff] }
 0x57b   :  { %v3287_v44 = vpack.c.bf16 %v1784_v33, %v1777_v12  ;;  %v1812_v57 = vadd.f32 %v1811_v17, %v1810_v41  ;;  %v1632_v22 = vmul.f32 %v2667_v39, %v3275_v18  ;;  %v1638_v52 = vmul.f32 %v2668_v25, %v1549_v49 }
 0x57c   :  { %v3290_v2 = vpack.c.bf16 %v1798_v27, %v1791_v10  ;;  %v1814_v9 = vrot.slane %v1813_v7, 4  ;;  %v1821_v37 = vrot.slane %v1820_v1, 4  ;;  %v1827_v30 = vadd.f32 %v1635_v36, %v1629_v63 }
 0x57d   :  { %v1834_v12 = vadd.f32 %v1636_v48, %v1630_v34  ;;  %v3293_v33 = vpack.c.bf16 %v1812_v57, %v1805_v58  ;;  %v1841_v42 = vadd.f32 %v1637_v56, %v1631_v16  ;;  %v1848_v17 = vadd.f32 %v1638_v52, %v1632_v22  ;;  %v2669_v16 = vld [vmem:[#allocation7 + $0x1b0] sm:$0xff]  ;;  %v2674_v58 = vld [vmem:[#allocation7 + $0x1d8] sm:$0xff] }
 0x57e   :  { %v1815_v50 = vadd.f32 %v1814_v9, %v1813_v7  ;;  %v1822_v19 = vadd.f32 %v1821_v37, %v1820_v1  ;;  %v1828_v41 = vrot.slane %v1827_v30, 4  ;;  %v1645_v56 = vmul.f32 %v2669_v16, %v1559_v53  ;;  %v2670_v37 = vld [vmem:[#allocation7 + $0x1b8] sm:$0xff] }
 0x57f   :  { %3479 = vst [vmem:[#allocation12_spill] sm:$0xff] %v3293_v33  ;;  %v1835_v10 = vrot.slane %v1834_v12, 4  ;;  %v1842_v27 = vrot.slane %v1841_v42, 4  ;;  %v1849_v46 = vrot.slane %v1848_v17, 4  ;;  %v1646_v55 = vmul.f32 %v2670_v37, %v1559_v53 }
 0x580   :  { %v1816_v63 = vrot.slane %v1815_v50, 2  ;;  %v1823_v34 = vrot.slane %v1822_v19, 2  ;;  %v1829_v36 = vadd.f32 %v1828_v41, %v1827_v30  ;;  %v1647_v22 = vmul.f32 %v2671_v3, %v1559_v53 }
 0x581   :  { %v1836_v48 = vadd.f32 %v1835_v10, %v1834_v12  ;;  %v1843_v29 = vadd.f32 %v1842_v27, %v1841_v42  ;;  %v1850_v9 = vadd.f32 %v1849_v46, %v1848_v17  ;;  %v2672_v27 = vld [vmem:[#allocation7 + $0x1c8] sm:$0xff]  ;;  %v1650_v17 = vmul.f32 %v2674_v58, %v1559_v53  ;;  %v1564_v58 = vpop.permute.xlu1 %1563 }
 0x582   :  { %v1817_v1 = vadd.f32 %v1816_v63, %v1815_v50  ;;  %v1824_v7 = vadd.f32 %v1823_v34, %v1822_v19  ;;  %v1830_v57 = vrot.slane %v1829_v36, 2  ;;  %v1648_v16 = vmul.f32 %v2672_v27, %v1559_v53  ;;  %v2673_v63 = vld [vmem:[#allocation7 + $0x1d0] sm:$0xff] }
 0x583   :  { %v1837_v39 = vrot.slane %v1836_v48, 2  ;;  %v1844_v25 = vrot.slane %v1843_v29, 2  ;;  %v1851_v10 = vrot.slane %v1850_v9, 2  ;;  %v1649_v34 = vmul.f32 %v2673_v63, %v1559_v53 }
 0x584   :  { %v1818_v52 = vrot.slane %v1817_v1, 1  ;;  %v1825_v60 = vrot.slane %v1824_v7, 1  ;;  %v1831_v30 = vadd.f32 %v1830_v57, %v1829_v36  ;;  %v1855_v3 = vadd.f32 %v1645_v56, %v3209_v4 }
 0x585   :  { %v1838_v12 = vadd.f32 %v1837_v39, %v1836_v48  ;;  %v1845_v42 = vadd.f32 %v1844_v25, %v1843_v29  ;;  %v1852_v37 = vadd.f32 %v1851_v10, %v1850_v9  ;;  %v1862_v49 = vadd.f32 %v1646_v55, %v3211_v24 }
 0x586   :  { %v1832_v50 = vrot.slane %v1831_v30, 1  ;;  %v1819_v36 = vadd.f32 %v1818_v52, %v1817_v1  ;;  %v1826_v48 = vadd.f32 %v1825_v60, %v1824_v7  ;;  %v1869_v29 = vadd.f32 %v1647_v22, %v3213_v15 }
 0x587   :  { %v1839_v19 = vrot.slane %v1838_v12, 1  ;;  %v1846_v46 = vrot.slane %v1845_v42, 1  ;;  %v1853_v25 = vrot.slane %v1852_v37, 1  ;;  %v1856_v27 = vrot.slane %v1855_v3, 4 }
 0x588   :  { %v1833_v57 = vadd.f32 %v1832_v50, %v1831_v30  ;;  %v1863_v41 = vrot.slane %v1862_v49, 4  ;;  %v1870_v14 = vrot.slane %v1869_v29, 4  ;;  %v1876_v63 = vadd.f32 %v1648_v16, %v3215_v31 }
 0x589   :  { %v1840_v39 = vadd.f32 %v1839_v19, %v1838_v12  ;;  %v1847_v18 = vadd.f32 %v1846_v46, %v1845_v42  ;;  %v1883_v53 = vadd.f32 %v1649_v34, %v3217_v47  ;;  %v1854_v9 = vadd.f32 %v1853_v25, %v1852_v37  ;;  %v2675_v47 = vld [vmem:[#allocation7 + $0x1e0] sm:$0xff]  ;;  %v2676_v34 = vld [vmem:[#allocation7 + $0x1e8] sm:$0xff]  ;;  %v1569_v46 = vpop.permute.xlu1 %1568 }
 0x58a   :  { %v1857_v4 = vadd.f32 %v1856_v27, %v1855_v3  ;;  %v1864_v56 = vadd.f32 %v1863_v41, %v1862_v49  ;;  %v1890_v24 = vadd.f32 %v1650_v17, %v3219_v8  ;;  %v3307_v60 = vpack.c.bf16 %v1826_v48, %v1819_v36  ;;  %v2677_v48 = vld [vmem:[#allocation7 + $0x1f0] sm:$0xff]  ;;  %v2678_v27 = vld [vmem:[#allocation7 + $0x1f8] sm:$0xff] }
 0x58b   :  { %v1871_v55 = vadd.f32 %v1870_v14, %v1869_v29  ;;  %v1877_v15 = vrot.slane %v1876_v63, 4  ;;  %v1884_v1 = vrot.slane %v1883_v53, 4  ;;  %v3309_v7 = vpack.c.bf16 %v1840_v39, %v1833_v57 }
 0x58c   :  { %v1858_v22 = vrot.slane %v1857_v4, 2  ;;  %v1865_v52 = vrot.slane %v1864_v56, 2  ;;  %v1891_v30 = vrot.slane %v1890_v24, 4  ;;  %v1651_v10 = vmul.f32 %v2675_v47, %v1564_v58 }
 0x58d   :  { %v1872_v12 = vrot.slane %v1871_v55, 2  ;;  %v1878_v31 = vadd.f32 %v1877_v15, %v1876_v63  ;;  %v1885_v42 = vadd.f32 %v1884_v1, %v1883_v53  ;;  %v3311_v16 = vpack.c.bf16 %v1854_v9, %v1847_v18  ;;  %v2680_v15 = vld [vmem:[#allocation7 + $0x200] sm:$0xff] }
 0x58e   :  { %v1859_v49 = vadd.f32 %v1858_v22, %v1857_v4  ;;  %v1866_v41 = vadd.f32 %v1865_v52, %v1864_v56  ;;  %v1892_v8 = vadd.f32 %v1891_v30, %v1890_v24  ;;  %v1652_v17 = vmul.f32 %v2676_v34, %v1564_v58  ;;  %v2679_v4 = vld [vmem:[#allocation7 + $0x210] sm:$0xff]  ;;  %v2681_v22 = vld [vmem:[#allocation7 + $0x218] sm:$0xff]  ;;  %v2683_v34 = vld [vmem:[#allocation7 + $0x220] sm:$0xff] }
 0x58f   :  { %v1873_v50 = vadd.f32 %v1872_v12, %v1871_v55  ;;  %v1879_v19 = vrot.slane %v1878_v31, 2  ;;  %v1886_v14 = vrot.slane %v1885_v42, 2  ;;  %v1653_v57 = vmul.f32 %v2677_v48, %v1564_v58  ;;  %v2682_v12 = vld [vmem:[#allocation7 + $0x208] sm:$0xff] }
 0x590   :  { %v1860_v37 = vrot.slane %v1859_v49, 1  ;;  %v1867_v3 = vrot.slane %v1866_v41, 1  ;;  %v1893_v36 = vrot.slane %v1892_v8, 2  ;;  %v1654_v18 = vmul.f32 %v2678_v27, %v1564_v58 }
 0x591   :  { %v1874_v29 = vrot.slane %v1873_v50, 1  ;;  %v1880_v39 = vadd.f32 %v1879_v19, %v1878_v31  ;;  %v1887_v25 = vadd.f32 %v1886_v14, %v1885_v42  ;;  %v1657_v56 = vmul.f32 %v2679_v4, %v1569_v46  ;;  %v2684_v31 = vld [vmem:[#allocation7 + $0x228] sm:$0xff] }
 0x592   :  { %v1861_v63 = vadd.f32 %v1860_v37, %v1859_v49  ;;  %v1868_v53 = vadd.f32 %v1867_v3, %v1866_v41  ;;  %v1894_v9 = vadd.f32 %v1893_v36, %v1892_v8  ;;  %v1655_v1 = vmul.f32 %v2680_v15, %v1564_v58  ;;  %v2685_v49 = vld [vmem:[#allocation7 + $0x230] sm:$0xff]  ;;  %v2686_v8 = vld [vmem:[#allocation7 + $0x238] sm:$0xff]  ;;  %v1574_v15 = vpop.permute.xlu1 %1573 }
 0x593   :  { %v1881_v24 = vrot.slane %v1880_v39, 1  ;;  %v1888_v55 = vrot.slane %v1887_v25, 1  ;;  %v1658_v52 = vmul.f32 %v2681_v22, %v1569_v46  ;;  %v1656_v47 = vmul.f32 %v2682_v12, %v1564_v58 }
 0x594   :  { %v1895_v30 = vrot.slane %v1894_v9, 1  ;;  %v1659_v48 = vmul.f32 %v2683_v34, %v1569_v46  ;;  %v1660_v42 = vmul.f32 %v2684_v31, %v1569_v46  ;;  %v1875_v19 = vadd.f32 %v1874_v29, %v1873_v50 }
 0x595   :  { %v1882_v14 = vadd.f32 %v1881_v24, %v1880_v39  ;;  %v1661_v41 = vmul.f32 %v2685_v49, %v1569_v46  ;;  %v1662_v37 = vmul.f32 %v2686_v8, %v1569_v46  ;;  %v3313_v3 = vpack.c.bf16 %v1868_v53, %v1861_v63  ;;  %v2690_v8 = vld [vmem:[#allocation7 + $0x258] sm:$0xff] }
 0x596   :  { %v1897_v36 = vadd.f32 %v1657_v56, %v1651_v10  ;;  %v1904_v27 = vadd.f32 %v1658_v52, %v1652_v17  ;;  %v1911_v4 = vadd.f32 %v1659_v48, %v1653_v57  ;;  %v3315_v22 = vadd.f32 %v1888_v55, %v1887_v25  ;;  %v2687_v57 = vld [vmem:[#allocation7 + $0x240] sm:$0xff]  ;;  %v2689_v48 = vld [vmem:[#allocation7 + $0x250] sm:$0xff] }
 0x597   :  { %v1918_v62 = vadd.f32 %v1660_v42, %v1654_v18  ;;  %v1925_v58 = vadd.f32 %v1661_v41, %v1655_v1  ;;  %v1932_v12 = vadd.f32 %v1662_v37, %v1656_v47  ;;  %v3317_v34 = vadd.f32 %v1895_v30, %v1894_v9  ;;  %v2688_v1 = vld [vmem:[#allocation7 + $0x248] sm:$0xff] }
 0x598   :  { %v1898_v31 = vrot.slane %v1897_v36, 4  ;;  %v1905_v50 = vrot.slane %v1904_v27, 4  ;;  %v1912_v29 = vrot.slane %v1911_v4, 4  ;;  %v3319_v39 = vpack.c.bf16 %v1882_v14, %v1875_v19  ;;  %v1579_v19 = vpop.permute.xlu1 %1578 }
 0x599   :  { %v1919_v24 = vrot.slane %v1918_v62, 4  ;;  %v1926_v46 = vrot.slane %v1925_v58, 4  ;;  %v1933_v63 = vrot.slane %v1932_v12, 4  ;;  %v1663_v56 = vmul.f32 %v2687_v57, %v1574_v15 }
 0x59a   :  { %v1899_v53 = vadd.f32 %v1898_v31, %v1897_v36  ;;  %v1906_v10 = vadd.f32 %v1905_v50, %v1904_v27  ;;  %v1913_v17 = vadd.f32 %v1912_v29, %v1911_v4  ;;  %v1664_v52 = vmul.f32 %v2688_v1, %v1574_v15  ;;  %v2691_v31 = vld [vmem:[#allocation7 + $0x260] sm:$0xff]  ;;  %v2692_v29 = vld [vmem:[#allocation7 + $0x270] sm:$0xff]  ;;  %v2693_v1 = vld [vmem:[#allocation7 + $0x278] sm:$0xff] }
 0x59b   :  { %v1920_v25 = vadd.f32 %v1919_v24, %v1918_v62  ;;  %v1927_v55 = vadd.f32 %v1926_v46, %v1925_v58  ;;  %v1934_v18 = vadd.f32 %v1933_v63, %v1932_v12  ;;  %v1665_v42 = vmul.f32 %v2689_v48, %v1574_v15 }
 0x59c   :  { %v1900_v9 = vrot.slane %v1899_v53, 2  ;;  %v1907_v30 = vrot.slane %v1906_v10, 2  ;;  %v1914_v47 = vrot.slane %v1913_v17, 2  ;;  %v1666_v37 = vmul.f32 %v2690_v8, %v1574_v15 }
 0x59d   :  { %v1921_v14 = vrot.slane %v1920_v25, 2  ;;  %v1928_v49 = vrot.slane %v1927_v55, 2  ;;  %v1935_v41 = vrot.slane %v1934_v18, 2  ;;  %v1667_v62 = vmul.f32 %v2691_v31, %v1574_v15 }
 0x59e   :  { %v1901_v36 = vadd.f32 %v1900_v9, %v1899_v53  ;;  %v1908_v27 = vadd.f32 %v1907_v30, %v1906_v10  ;;  %v1915_v4 = vadd.f32 %v1914_v47, %v1913_v17  ;;  %v1669_v24 = vmul.f32 %v2692_v29, %v1579_v19  ;;  %v2695_v53 = vld [vmem:[#allocation7 + $0x280] sm:$0xff]  ;;  %v1584_v30 = vpop.permute.xlu1 %1583 }
 0x59f   :  { %v1922_v58 = vadd.f32 %v1921_v14, %v1920_v25  ;;  %v1929_v12 = vadd.f32 %v1928_v49, %v1927_v55  ;;  %v3321_v50 = vadd.f32 %v1935_v41, %v1934_v18  ;;  %v1670_v48 = vmul.f32 %v2693_v1, %v1579_v19  ;;  %v2696_v55 = vld [vmem:[#allocation7 + $0x288] sm:$0xff]  ;;  %v2697_v41 = vld [vmem:[#allocation7 + $0x290] sm:$0xff]  ;;  %v2699_v1 = vld [vmem:[#allocation7 + $0x2a0] sm:$0xff] }
 0x5a0   :  { %v1902_v46 = vrot.slane %v1901_v36, 1  ;;  %v1909_v63 = vrot.slane %v1908_v27, 1  ;;  %v1916_v57 = vrot.slane %v1915_v4, 1  ;;  %v1668_v8 = vmul.f32 %v2694_v5, %v1574_v15  ;;  %v2698_v5 = vld [vmem:[#allocation7 + $0x298] sm:$0xff] }
 0x5a1   :  { %v1923_v61 = vrot.slane %v1922_v58, 1  ;;  %v1930_v6 = vrot.slane %v1929_v12, 1  ;;  %v1671_v10 = vmul.f32 %v2695_v53, %v1579_v19  ;;  %v1937_v25 = vrot.slane %v3321_v50, 1 }
 0x5a2   :  { %v3323_v17 = vadd.f32 %v1902_v46, %v1901_v36  ;;  %v3325_v9 = vadd.f32 %v1909_v63, %v1908_v27  ;;  %v1672_v18 = vmul.f32 %v2696_v55, %v1579_v19  ;;  %v3328_v47 = vadd.f32 %v1916_v57, %v1915_v4 }
 0x5a3   :  { %v3330_v14 = vadd.f32 %v1923_v61, %v1922_v58  ;;  %v3332_v49 = vadd.f32 %v1930_v6, %v1929_v12  ;;  %v1673_v31 = vmul.f32 %v2697_v41, %v1579_v19  ;;  %v1674_v15 = vmul.f32 %v2698_v5, %v1579_v19  ;;  %v2701_v12 = vld [vmem:[#allocation7 + $0x2b0] sm:$0xff]  ;;  %v2702_v41 = vld [vmem:[#allocation7 + $0x2b8] sm:$0xff] }
 0x5a4   :  { %v1939_v29 = vadd.f32 %v1669_v24, %v1663_v56  ;;  %v1946_v36 = vadd.f32 %v1670_v48, %v1664_v52  ;;  %v1953_v46 = vadd.f32 %v1671_v10, %v1665_v42  ;;  %v1960_v27 = vadd.f32 %v1672_v18, %v1666_v37  ;;  %v2703_v24 = vld [vmem:[#allocation7 + $0x2c0] sm:$0xff]  ;;  %v2704_v10 = vld [vmem:[#allocation7 + $0x2c8] sm:$0xff] }
 0x5a5   :  { %v1967_v63 = vadd.f32 %v1673_v31, %v1667_v62  ;;  %v1675_v53 = vmul.f32 %v2699_v1, %v1584_v30  ;;  %v1676_v55 = vmul.f32 %v2700_v26, %v1584_v30  ;;  %v1974_v61 = vadd.f32 %v1674_v15, %v1668_v8 }
 0x5a6   :  { %v1940_v13 = vrot.slane %v1939_v29, 4  ;;  %v1947_v4 = vrot.slane %v1946_v36, 4  ;;  %v1954_v57 = vrot.slane %v1953_v46, 4  ;;  %v1961_v58 = vrot.slane %v1960_v27, 4 }
 0x5a7   :  { %v1968_v6 = vrot.slane %v1967_v63, 4  ;;  %v1677_v28 = vmul.f32 %v2701_v12, %v1584_v30  ;;  %v1678_v45 = vmul.f32 %v2702_v41, %v1584_v30  ;;  %v1975_v42 = vrot.slane %v1974_v61, 4 }
 0x5a8   :  { %v1941_v19 = vadd.f32 %v1940_v13, %v1939_v29  ;;  %v1948_v56 = vadd.f32 %v1947_v4, %v1946_v36  ;;  %v1955_v52 = vadd.f32 %v1954_v57, %v1953_v46  ;;  %v1962_v37 = vadd.f32 %v1961_v58, %v1960_v27 }
 0x5a9   :  { %v1969_v62 = vadd.f32 %v1968_v6, %v1967_v63  ;;  %v1679_v48 = vmul.f32 %v2703_v24, %v1584_v30  ;;  %v1680_v26 = vmul.f32 %v2704_v10, %v1584_v30  ;;  %v1976_v8 = vadd.f32 %v1975_v42, %v1974_v61 }
 0x5aa   :  { %v1942_v18 = vrot.slane %v1941_v19, 2  ;;  %v1949_v31 = vrot.slane %v1948_v56, 2  ;;  %v1956_v5 = vrot.slane %v1955_v52, 2  ;;  %v1963_v15 = vrot.slane %v1962_v37, 2 }
 0x5ab   :  { %v1970_v1 = vrot.slane %v1969_v62, 2  ;;  %v1981_v12 = vadd.f32 %v3224_v0, %v1675_v53  ;;  %v1988_v41 = vadd.f32 %v3227_v51, %v1676_v55  ;;  %v1977_v46 = vrot.slane %v1976_v8, 2 }
 0x5ac   :  { %v1943_v13 = vadd.f32 %v1942_v18, %v1941_v19  ;;  %v1950_v29 = vadd.f32 %v1949_v31, %v1948_v56  ;;  %v1957_v36 = vadd.f32 %v1956_v5, %v1955_v52  ;;  %v1964_v27 = vadd.f32 %v1963_v15, %v1962_v37 }
 0x5ad   :  { %v1971_v63 = vadd.f32 %v1970_v1, %v1969_v62  ;;  %v1982_v4 = vrot.slane %v1981_v12, 4  ;;  %v1989_v57 = vrot.slane %v1988_v41, 4  ;;  %v1938_v30 = vadd.f32 %v1937_v25, %v3321_v50 }
 0x5ae   :  { %v1944_v58 = vrot.slane %v1943_v13, 1  ;;  %v1951_v6 = vrot.slane %v1950_v29, 1  ;;  %v1978_v24 = vadd.f32 %v1977_v46, %v1976_v8  ;;  %v1958_v61 = vrot.slane %v1957_v36, 1 }
 0x5af   :  { %v1965_v42 = vrot.slane %v1964_v27, 1  ;;  %v1983_v10 = vadd.f32 %v1982_v4, %v1981_v12  ;;  %v1990_v32 = vadd.f32 %v1989_v57, %v1988_v41  ;;  %v1972_v0 = vrot.slane %v1971_v63, 1 }
 0x5b0   :  { %v1995_v51 = vadd.f32 %v3230_v35, %v1677_v28  ;;  %v2002_v53 = vadd.f32 %v3233_v59, %v1678_v45  ;;  %v2009_v55 = vadd.f32 %v3238_v21, %v1679_v48  ;;  %v1979_v19 = vrot.slane %v1978_v24, 1 }
 0x5b1   :  { %v1984_v56 = vrot.slane %v1983_v10, 2  ;;  %v1991_v52 = vrot.slane %v1990_v32, 2  ;;  %v2016_v37 = vadd.f32 %v3252_v38, %v1680_v26  ;;  %v1945_v18 = vadd.f32 %v1944_v58, %v1943_v13 }
 0x5b2   :  { %v1996_v50 = vrot.slane %v1995_v51, 4  ;;  %v2003_v25 = vrot.slane %v2002_v53, 4  ;;  %v2010_v62 = vrot.slane %v2009_v55, 4  ;;  %v1952_v15 = vadd.f32 %v1951_v6, %v1950_v29 }
 0x5b3   :  { %v1985_v31 = vadd.f32 %v1984_v56, %v1983_v10  ;;  %v1992_v5 = vadd.f32 %v1991_v52, %v1990_v32  ;;  %v2017_v8 = vrot.slane %v2016_v37, 4  ;;  %v1959_v28 = vadd.f32 %v1958_v61, %v1957_v36 }
 0x5b4   :  { %v1997_v1 = vadd.f32 %v1996_v50, %v1995_v51  ;;  %v2004_v12 = vadd.f32 %v2003_v25, %v2002_v53  ;;  %v2011_v35 = vadd.f32 %v2010_v62, %v2009_v55  ;;  %v1966_v48 = vadd.f32 %v1965_v42, %v1964_v27 }
 0x5b5   :  { %v1986_v59 = vrot.slane %v1985_v31, 1  ;;  %v1993_v45 = vrot.slane %v1992_v5, 1  ;;  %v2018_v21 = vadd.f32 %v2017_v8, %v2016_v37  ;;  %v1973_v38 = vadd.f32 %v1972_v0, %v1971_v63 }
 0x5b6   :  { %v1998_v41 = vrot.slane %v1997_v1, 2  ;;  %v2005_v46 = vrot.slane %v2004_v12, 2  ;;  %v2012_v4 = vrot.slane %v2011_v35, 2  ;;  %v1980_v13 = vadd.f32 %v1979_v19, %v1978_v24 }
 0x5b7   :  { %v1987_v26 = vadd.f32 %v1986_v59, %v1985_v31  ;;  %v1994_v57 = vadd.f32 %v1993_v45, %v1992_v5  ;;  %v2019_v33 = vrot.slane %v2018_v21, 2  ;;  %v3343_v32 = vpack.c.bf16 %v3317_v34, %v3315_v22 }
 0x5b8   :  { %v1999_v29 = vadd.f32 %v1998_v41, %v1997_v1  ;;  %v2006_v58 = vadd.f32 %v2005_v46, %v2004_v12  ;;  %v2013_v6 = vadd.f32 %v2012_v4, %v2011_v35  ;;  %v2393_v61 = vpack.c.bf16 %v3325_v9, %v3323_v17 }
 0x5b9   :  { %v2020_v36 = vadd.f32 %v2019_v33, %v2018_v21  ;;  %v3349_v27 = vpack.c.bf16 %v3330_v14, %v3328_v47  ;;  %v3352_v63 = vpack.c.bf16 %v1938_v30, %v3332_v49  ;;  %v2396_v0 = vpack.c.bf16 %v1952_v15, %v1945_v18 }
 0x5ba   :  { %v2000_v42 = vrot.slane %v1999_v29, 1  ;;  %v2007_v24 = vrot.slane %v2006_v58, 1  ;;  %v2014_v10 = vrot.slane %v2013_v6, 1  ;;  %v3354_v34 = vpack.c.bf16 %v1966_v48, %v1959_v28 }
 0x5bb   :  { %v2021_v22 = vrot.slane %v2020_v36, 1  ;;  %v3356_v51 = vpack.c.bf16 %v1980_v13, %v1973_v38  ;;  %v2399_v33 = vpack.c.bf16 %v1994_v57, %v1987_v26  ;;  %v2209_v9 = vunpack.c.l.b16 %v3307_v60 }
 0x5bc   :  { %v2001_v53 = vadd.f32 %v2000_v42, %v1999_v29  ;;  %v2008_v55 = vadd.f32 %v2007_v24, %v2006_v58  ;;  %v2015_v17 = vadd.f32 %v2014_v10, %v2013_v6  ;;  %v2210_v14 = vunpack.c.h.b16 %v3307_v60 }
 0x5bd   :  { %v2022_v47 = vadd.f32 %v2021_v22, %v2020_v36  ;;  %v2211_v49 = vunpack.c.l.b16 %v3309_v7  ;;  %v2212_v30 = vunpack.c.h.b16 %v3309_v7  ;;  %v2213_v56 = vunpack.c.l.b16 %v3311_v16 }
 0x5be   :  { %v2400_v19 = vpack.c.bf16 %v2008_v55, %v2001_v53  ;;  %v2214_v52 = vunpack.c.h.b16 %v3311_v16  ;;  %v2215_v37 = vunpack.c.l.b16 %v3313_v3  ;;  %v2216_v25 = vunpack.c.h.b16 %v3313_v3 }
 0x5bf   :  { %v3365_v50 = vpack.c.bf16 %v2022_v47, %v2015_v17  ;;  %v2217_v62 = vunpack.c.l.b16 %v3319_v39  ;;  %v2218_v18 = vunpack.c.h.b16 %v3319_v39  ;;  %v2219_v60 = vunpack.c.l.b16 %v3343_v32 }
 0x5c0   :  { %v2220_v31 = vunpack.c.h.b16 %v3343_v32  ;;  %v2221_v7 = vunpack.c.l.b16 %v2393_v61  ;;  %v2222_v5 = vunpack.c.h.b16 %v2393_v61  ;;  %v2223_v8 = vunpack.c.l.b16 %v3349_v27 }
 0x5c1   :  { %v2224_v16 = vunpack.c.h.b16 %v3349_v27  ;;  %v2225_v15 = vunpack.c.l.b16 %v3352_v63  ;;  %v2226_v1 = vunpack.c.h.b16 %v3352_v63  ;;  %v2227_v12 = vunpack.c.l.b16 %v2396_v0 }
 0x5c2   :  { %v2228_v3 = vunpack.c.h.b16 %v2396_v0  ;;  %v2229_v35 = vunpack.c.l.b16 %v3354_v34  ;;  %v2230_v39 = vunpack.c.h.b16 %v3354_v34  ;;  %v2231_v28 = vunpack.c.l.b16 %v3356_v51 }
 0x5c3   :  { %v2232_v59 = vunpack.c.h.b16 %v3356_v51  ;;  %v2233_v45 = vunpack.c.l.b16 %v2399_v33  ;;  %v2234_v21 = vunpack.c.h.b16 %v2399_v33  ;;  %v2235_v48 = vunpack.c.l.b16 %v2400_v19 }
 0x5c4   :  { %v2236_v41 = vunpack.c.h.b16 %v2400_v19  ;;  %v3480_v46 = vunpack.c.l.b16 %v3245_v40  ;;  %v3481_v4 = vunpack.c.l.b16 %v3267_v54  ;;  %v3482_v26 = vunpack.c.h.b16 %v3245_v40 }
 0x5c5   :  { %v3483_v57 = vunpack.c.h.b16 %v3267_v54  ;;  %v3484_v32 = vunpack.c.l.b16 %v3287_v44  ;;  %v3485_v58 = vunpack.c.h.b16 %v3287_v44  ;;  %v3486_v36 = vunpack.c.l.b16 %v3247_v20 }
 0x5c6   :  { %v2239_v38 = vsel %vm1198_vm1, %v3481_v4, %v3480_v46  ;;  %v3487_v61 = vunpack.c.l.b16 %v3270_v11  ;;  %v3488_v40 = vunpack.c.h.b16 %v3247_v20  ;;  %v3489_v54 = vunpack.c.h.b16 %v3270_v11 }
 0x5c7   :  { %v2246_v13 = vsel %vm1198_vm1, %v3483_v57, %v3482_v26  ;;  %v2240_v29 = vsel %vm1200_vm2, %v3484_v32, %v2239_v38  ;;  %v3490_v44 = vunpack.c.l.b16 %v3290_v2  ;;  %v3491_v0 = vunpack.c.h.b16 %v3290_v2 }
 0x5c8   :  { %v2247_v6 = vsel %vm1200_vm2, %v3485_v58, %v2246_v13  ;;  %v2253_v27 = vsel %vm1198_vm1, %v3487_v61, %v3486_v36  ;;  %v2260_v63 = vsel %vm1198_vm1, %v3489_v54, %v3488_v40  ;;  %v2241_v42 = vsel %vm1202_vm3, %v2209_v9, %v2240_v29 }
 0x5c9   :  { %v2248_v24 = vsel %vm1202_vm3, %v2210_v14, %v2247_v6  ;;  %v2254_v10 = vsel %vm1200_vm2, %v3490_v44, %v2253_v27  ;;  %v2261_v22 = vsel %vm1200_vm2, %v3491_v0, %v2260_v63  ;;  %v2242_v34 = vsel %vm1204_vm4, %v2215_v37, %v2241_v42 }
 0x5ca   :  { %v2249_v20 = vsel %vm1204_vm4, %v2216_v25, %v2248_v24  ;;  %v2255_v11 = vsel %vm1202_vm3, %v2211_v49, %v2254_v10  ;;  %v2262_v51 = vsel %vm1202_vm3, %v2212_v30, %v2261_v22  ;;  %v2243_v33 = vsel %vm1206_vm5, %v2221_v7, %v2242_v34 }
 0x5cb   :  { %v2250_v53 = vsel %vm1206_vm5, %v2222_v5, %v2249_v20  ;;  %v2256_v55 = vsel %vm1204_vm4, %v2217_v62, %v2255_v11  ;;  %v2263_v17 = vsel %vm1204_vm4, %v2218_v18, %v2262_v51  ;;  %v2244_v2 = vsel %vm1208_vm6, %v2227_v12, %v2243_v33 }
 0x5cc   :  { %v2251_v9 = vsel %vm1208_vm6, %v2228_v3, %v2250_v53  ;;  %v2257_v47 = vsel %vm1206_vm5, %v2223_v8, %v2256_v55  ;;  %v2264_v14 = vsel %vm1206_vm5, %v2224_v16, %v2263_v17  ;;  %v2245_v49 = vsel %vm1210_vm7, %v2233_v45, %v2244_v2  ;;  %v3496_v3 = vld [vmem:[#allocation12_spill] sm:$0xff] }
 0x5cd   :  { %v2252_v30 = vsel %vm1210_vm7, %v2234_v21, %v2251_v9  ;;  %v2258_v19 = vsel %vm1208_vm6, %v2229_v35, %v2257_v47  ;;  %v2265_v37 = vsel %vm1208_vm6, %v2230_v39, %v2264_v14  ;;  %v3492_v18 = vunpack.c.l.b16 %v3249_v23 }
 0x5ce   :  { %v2259_v25 = vsel %vm1210_vm7, %v2235_v48, %v2258_v19  ;;  %v2266_v62 = vsel %vm1210_vm7, %v2236_v41, %v2265_v37  ;;  %v3493_v7 = vunpack.c.l.b16 %v3277_v43  ;;  %v3494_v8 = vunpack.c.h.b16 %v3249_v23 }
 0x5cf   :  { %v3495_v16 = vunpack.c.h.b16 %v3277_v43  ;;  %v3497_v35 = vunpack.c.l.b16 %v3496_v3  ;;  %v3498_v45 = vunpack.c.h.b16 %v3496_v3  ;;  %v2281_v48 = vpack.c.b16 %v2252_v30, %v2245_v49 }
 0x5d0   :  { %v2267_v5 = vsel %vm1198_vm1, %v3493_v7, %v3492_v18  ;;  %v2282_v41 = vpack.c.b16 %v2266_v62, %v2259_v25  ;;  %v2237_v46 = vunpack.c.l.b16 %v3365_v50  ;;  %v2238_v4 = vunpack.c.h.b16 %v3365_v50 }
 0x5d1   :  { %v2274_v12 = vsel %vm1198_vm1, %v3495_v16, %v3494_v8  ;;  %v2268_v39 = vsel %vm1200_vm2, %v3497_v35, %v2267_v5  ;;  %2287 = vst [vmem:[#allocation8] sm:$0xff] %v2281_v48 }
 0x5d2   :  { %v2275_v21 = vsel %vm1200_vm2, %v3498_v45, %v2274_v12  ;;  %v2269_v23 = vsel %vm1202_vm3, %v2213_v56, %v2268_v39  ;;  %2288 = vst [vmem:[#allocation8 + $0x8] sm:$0xff] %v2282_v41 }
 0x5d3   :  { %v2276_v43 = vsel %vm1202_vm3, %v2214_v52, %v2275_v21  ;;  %v2270_v38 = vsel %vm1204_vm4, %v2219_v60, %v2269_v23 }
 0x5d4   :  { %v2277_v26 = vsel %vm1204_vm4, %v2220_v31, %v2276_v43  ;;  %v2271_v57 = vsel %vm1206_vm5, %v2225_v15, %v2270_v38 }
 0x5d5   :  { %v2278_v13 = vsel %vm1206_vm5, %v2226_v1, %v2277_v26  ;;  %v2272_v32 = vsel %vm1208_vm6, %v2231_v28, %v2271_v57 }
 0x5d6   :  { %v2279_v50 = vsel %vm1208_vm6, %v2232_v59, %v2278_v13  ;;  %v2273_v56 = vsel %vm1210_vm7, %v2237_v46, %v2272_v32 }
 0x5d7   :  { %v2280_v52 = vsel %vm1210_vm7, %v2238_v4, %v2279_v50 }
 0x5d8   :  { %v2283_v29 = vpack.c.b16 %v2280_v52, %v2273_v56 }
 0x5da   :  { %2289 = vst [vmem:[#allocation8 + $0x10] sm:$0xff] %v2283_v29 }
 0x5db   :  { %2782 = shalt.err (!%p2779_p0)
}
 0x5dc   :  { %s2783_s6 = scalar_lea.hbm %s3476_s4, 384 }
 0x5dd   :  { %p2784_p1 = scmp.ne.s32.totalorder %s3476_s4, %s2783_s6  ;;  %p2787_p2 = scmp.lt.u32.totalorder %s2783_s6, %s3476_s4 }
 0x5df   :  { %p2789_p3 = pnand %p2787_p2, %p2784_p1 }
 0x5e1   :  { %2792 = shalt.err (!%p2789_p3)
}
 0x5e2   :  { %2299 = dma.vmem_to_hbm [thread:$0]  %s2297_s28, 384, %s3476_s4, [#allocation4]  }
 0x5e3   :  { %2797 = dma.done.wait [#allocation4], 384  }
 0x5e4   :  { %2798 = vsyncadd [#allocation4], 4294966912 }
 0x5e5   :  { %2303 = vsyncpa [#allocation3], 1 }
 0x5e6   :  { %2304 = vsyncpa [#allocation6], 1 }
 0x5e7   :  { %2305 = vsyncpa [#allocation4], 1 }

</bundles_post_ra>
